<compile_context>
chip_gen: v6e
topology: v6e:2x2x1
jax: 0.10.0
libtpu: 0.0.40
codegen_flags: <defaults>
</compile_context>

<pallas_src>
import functools

import jax
import jax.numpy as jnp
from jax.experimental import pallas as pl
from jax.experimental.pallas import tpu as pltpu


def _round_up(n, m):
    return ((n + m - 1) // m) * m


# --------------------------------------------------------------------------
# Kernel body: one MXU matmul over the fused weight + fused gate epilogue.
# --------------------------------------------------------------------------
def _tri_gating_kernel(m_ref, w_ref, b_ref, o_ta_ref, o_tv_ref, o_va_ref, *, h_pad):
    x = m_ref[...]
    # [bm, D] @ [D, 9*H_pad] -> f32 accumulator.  If the weight is stored in
    # bf16, cast activations to bf16 too (f32 accumulate on the MXU).
    z = jnp.dot(x.astype(w_ref.dtype), w_ref[...],
                preferred_element_type=jnp.float32)
    z = z + b_ref[...]

    for g, o_ref in enumerate((o_ta_ref, o_tv_ref, o_va_ref)):
        c = 3 * g * h_pad                                   # lane-aligned
        h1 = jnp.tanh(z[:, c:c + h_pad])                    # EUP
        h2 = jnp.tanh(z[:, c + h_pad:c + 2 * h_pad])        # EUP
        z1 = jnp.maximum(z[:, c + 2 * h_pad:c + 3 * h_pad], 0.0)  # VPU
        # out = z1*h1 + (1-z1)*h2, with one fewer multiply.
        o_ref[...] = (h2 + z1 * (h1 - h2)).astype(o_ref.dtype)


# --------------------------------------------------------------------------
# Offline (per-parameter-update) fusion of the 9 Linears into one operand.
# --------------------------------------------------------------------------
def make_tri_gating_params(ta_params, tv_params, va_params, t_dim, a_dim, v_dim,
                           *, weight_dtype=jnp.float32):
    """Build the fused weight/bias ONCE — not inside the per-forward hot path.

    ta/tv/va params: (w1, b1, w2, b2, w3, b3) in PyTorch nn.Linear layout
    (w*: [H, in], b*: [H]).  The fused weight maps the shared feature vector
    m = concat([text, audio, video], -1) of width D = t_dim + a_dim + v_dim.

    Returns (w_fused [D, 9*H_pad] in weight_dtype, b_fused [1, 9*H_pad] f32, H).
    Column layout: for gate g, [3g*H_pad .. 3g*H_pad+H_pad) -> Linear1 (h1),
    next H_pad -> Linear2 (h2), next H_pad -> Linear3 (z1).  Padded columns
    carry zero weight and zero bias -> exact zeros in the output.
    """
    d = t_dim + a_dim + v_dim
    h = ta_params[0].shape[0]
    h_pad = _round_up(h, 128)
    f32 = jnp.float32

    # (x_offset, x_size, y_offset, y_size) of each gate's inputs inside m.
    layouts = (
        (0, t_dim, t_dim, a_dim),              # ta: x = text,  y = audio
        (0, t_dim, t_dim + a_dim, v_dim),      # tv: x = text,  y = video
        (t_dim + a_dim, v_dim, t_dim, a_dim),  # va: x = video, y = audio
    )

    wf = jnp.zeros((d, 9 * h_pad), dtype=f32)
    bf = jnp.zeros((1, 9 * h_pad), dtype=f32)
    for g, (params, (ox, dx, oy, dy)) in enumerate(
            zip((ta_params, tv_params, va_params), layouts)):
        w1, b1, w2, b2, w3, b3 = params
        assert w1.shape == (h, dx) and w2.shape == (h, dy) and w3.shape == (h, dx + dy)
        c = 3 * g * h_pad
        wf = wf.at[ox:ox + dx, c:c + h].set(w1.T.astype(f32))
        wf = wf.at[oy:oy + dy, c + h_pad:c + h_pad + h].set(w2.T.astype(f32))
        wf = wf.at[ox:ox + dx, c + 2 * h_pad:c + 2 * h_pad + h].set(w3[:, :dx].T.astype(f32))
        wf = wf.at[oy:oy + dy, c + 2 * h_pad:c + 2 * h_pad + h].set(w3[:, dx:].T.astype(f32))
        bf = bf.at[0, c:c + h].set(b1.astype(f32))
        bf = bf.at[0, c + h_pad:c + h_pad + h].set(b2.astype(f32))
        bf = bf.at[0, c + 2 * h_pad:c + 2 * h_pad + h].set(b3.astype(f32))
    return wf.astype(weight_dtype), bf, h


# --------------------------------------------------------------------------
# VMEM budgeting helpers.
# --------------------------------------------------------------------------
def _vmem_capacity_bytes():
    try:
        return int(pltpu.get_tpu_info().vmem_capacity_bytes)
    except Exception:
        return 64 << 20   # v7x floor — the smallest of current generations


def _vmem_estimate_bytes(bm, d, n_cols, h_pad, w_itemsize, single_buffer_weights):
    f32 = 4
    wbufs = 1 if single_buffer_weights else 2
    return (2 * bm * d * f32                     # m tiles (double-buffered)
            + wbufs * d * n_cols * w_itemsize    # fused weight (grid-invariant)
            + wbufs * n_cols * f32               # fused bias
            + 2 * 3 * bm * h_pad * f32           # 3 output tiles (double-buffered)
            + bm * n_cols * f32                  # z pre-activations (f32)
            + 6 * bm * h_pad * f32)              # epilogue temporaries (h1/h2/z1/out)


# --------------------------------------------------------------------------
# Hot path.
# --------------------------------------------------------------------------
def _build_tri_gating_call(B, D, n_cols, h_pad, bm, out_dtype, vmem_limit,
                           single_buffer_weights):
    wspec_kwargs = {}
    if single_buffer_weights:
        # Grid-invariant operands never get re-fetched; drop the useless
        # second pipeline buffer so the resident weight only costs 1x VMEM.
        wspec_kwargs = dict(pipeline_mode=pl.Buffered(1))
    nb = pl.cdiv(B, bm)
    return pl.pallas_call(
        functools.partial(_tri_gating_kernel, h_pad=h_pad),
        out_shape=tuple(jax.ShapeDtypeStruct((B, h_pad), out_dtype) for _ in range(3)),
        grid=(nb,),
        in_specs=[
            pl.BlockSpec((bm, D), lambda i: (i, 0)),                        # m
            pl.BlockSpec((D, n_cols), lambda i: (0, 0), **wspec_kwargs),    # W_fused
            pl.BlockSpec((1, n_cols), lambda i: (0, 0), **wspec_kwargs),    # b_fused
        ],
        out_specs=[pl.BlockSpec((bm, h_pad), lambda i: (i, 0)) for _ in range(3)],
        compiler_params=pltpu.CompilerParams(
            dimension_semantics=("parallel",),
            vmem_limit_bytes=vmem_limit,
        ),
    )


@functools.partial(jax.jit,
                   static_argnames=("out_features", "block_m", "single_buffer_weights"))
def _tri_gating_impl(m, w_fused, b_fused, *, out_features, block_m,
                     single_buffer_weights):
    B, D = m.shape
    n_cols = w_fused.shape[1]
    assert n_cols % 9 == 0 and w_fused.shape[0] == D
    h_pad = n_cols // 9

    # ---- batch tile: big enough to amortize grid overhead, capped so that
    # B > 256 always yields >= 2 "parallel" steps (v7x megacore), and reduced
    # if the VMEM estimate would not fit the physical capacity.
    if block_m is None:
        bm = min(_round_up(B, 8), 256)
    else:
        bm = max(8, min(_round_up(int(block_m), 8), _round_up(B, 8)))
    cap = _vmem_capacity_bytes()
    while bm > 8 and _vmem_estimate_bytes(
            bm, D, n_cols, h_pad, w_fused.dtype.itemsize,
            single_buffer_weights) * 1.4 > cap * 0.9:
        bm = max(8, _round_up(bm // 2, 8))

    est = _vmem_estimate_bytes(bm, D, n_cols, h_pad, w_fused.dtype.itemsize,
                               single_buffer_weights)
    vmem_limit = min(cap, max(16 << 20, int(est * 1.5) + (4 << 20)))

    call = _build_tri_gating_call(B, D, n_cols, h_pad, bm, m.dtype, vmem_limit,
                                  single_buffer_weights)
    o_ta, o_tv, o_va = call(m, w_fused, b_fused)
    if h_pad != out_features:   # MCM's H=512 is 128-aligned -> no slice at all
        o_ta = o_ta[:, :out_features]
        o_tv = o_tv[:, :out_features]
        o_va = o_va[:, :out_features]
    return o_ta, o_tv, o_va


_BUFFERED_ONE_OK = None   # probed lazily; falls back if pl.Buffered(1) rejected


def tri_gating(m, w_fused, b_fused, *, out_features, block_m=None):
    """Fused ta/tv/va BiModal_Gating forward.

    m: [B, D] = concat([text, audio, video], -1) (shared with MCM's fusion_h).
    w_fused/b_fused: from make_tri_gating_params (precomputed once).
    Returns (ta_fusion_h, tv_fusion_h, va_fusion_h), each [B, out_features].
    """
    global _BUFFERED_ONE_OK
    if _BUFFERED_ONE_OK is None:
        try:
            out = _tri_gating_impl(m, w_fused, b_fused, out_features=out_features,
                                   block_m=block_m, single_buffer_weights=True)
            jax.block_until_ready(out)
            _BUFFERED_ONE_OK = True
            return out
        except Exception:
            _BUFFERED_ONE_OK = False
    return _tri_gating_impl(m, w_fused, b_fused, out_features=out_features,
                            block_m=block_m,
                            single_buffer_weights=_BUFFERED_ONE_OK)


# --------------------------------------------------------------------------
# Pure-JAX reference of one BiModal_Gating.
# --------------------------------------------------------------------------
def _gating_reference(x, y, params):
    w1, b1, w2, b2, w3, b3 = params
    h1 = jnp.tanh(x @ w1.T + b1)
    h2 = jnp.tanh(y @ w2.T + b2)
    z1 = jax.nn.relu(jnp.concatenate([x, y], axis=1) @ w3.T + b3)
    return z1 * h1 + (1.0 - z1) * h2


if __name__ == "__main__":
    # Small shapes consistent with MCM's gating usage (t_dim / audio_out /
    # video_out / hidden), scaled down.  H=96 (not 128-aligned) exercises the
    # padded-column path; real MCM uses H=512 which needs no slicing.
    B, Dt, Da, Dv, H = 24, 48, 16, 24, 96

    keys = iter(jax.random.split(jax.random.PRNGKey(0), 32))

    text = jax.random.normal(next(keys), (B, Dt), dtype=jnp.float32)
    audio = jax.random.normal(next(keys), (B, Da), dtype=jnp.float32)
    video = jax.random.normal(next(keys), (B, Dv), dtype=jnp.float32)

    def make_linear(out_d, in_d):
        return (0.1 * jax.random.normal(next(keys), (out_d, in_d), dtype=jnp.float32),
                0.1 * jax.random.normal(next(keys), (out_d,), dtype=jnp.float32))

    def make_gate(dx, dy):
        w1, b1 = make_linear(H, dx)
        w2, b2 = make_linear(H, dy)
        w3, b3 = make_linear(H, dx + dy)
        return (w1, b1, w2, b2, w3, b3)

    ta_p = make_gate(Dt, Da)   # ta_gating(text, audio)
    tv_p = make_gate(Dt, Dv)   # tv_gating(text, video)
    va_p = make_gate(Dv, Da)   # va_gating(video, audio)

    # Precompute the fused weights ONCE (hoisted out of the per-forward path).
    wf, bfb, h = make_tri_gating_params(ta_p, tv_p, va_p, Dt, Da, Dv)

    # Hot path: one concat (shared with MCM's own fusion_h) + ONE pallas_call.
    m = jnp.concatenate([text, audio, video], axis=1)
    out_ta, out_tv, out_va = tri_gating(m, wf, bfb, out_features=h)
    jax.block_until_ready((out_ta, out_tv, out_va))

    ref_ta = _gating_reference(text, audio, ta_p)
    ref_tv = _gating_reference(text, video, tv_p)
    ref_va = _gating_reference(video, audio, va_p)

    for got, ref, name in ((out_ta, ref_ta, "ta"), (out_tv, ref_tv, "tv"),
                           (out_va, ref_va, "va")):
        assert got.shape == (B, H), f"bad shape ({name})"
        assert jnp.allclose(got, ref, atol=2e-5, rtol=2e-5), f"mismatch ({name})"

    # Forced small tile: multi-step "parallel" grid + padded tail block
    # (B=24 is not a multiple of 16; discarded padded rows are benign).
    out2 = tri_gating(m, wf, bfb, out_features=h, block_m=16)
    jax.block_until_ready(out2)
    for got, ref, name in zip(out2, (ref_ta, ref_tv, ref_va), ("ta", "tv", "va")):
        assert jnp.allclose(got, ref, atol=2e-5, rtol=2e-5), f"mismatch tiled ({name})"

    # Optional bf16-stored weights (halves weight DMA/VMEM, ~3x MXU rate on
    # v6e/v7x); looser tolerance since the matmul inputs are bf16.
    wf16, bf16b, _ = make_tri_gating_params(ta_p, tv_p, va_p, Dt, Da, Dv,
                                            weight_dtype=jnp.bfloat16)
    out3 = tri_gating(m, wf16, bf16b, out_features=h)
    jax.block_until_ready(out3)
    for got, ref, name in zip(out3, (ref_ta, ref_tv, ref_va), ("ta", "tv", "va")):
        assert jnp.allclose(got, ref, atol=3e-2, rtol=3e-2), f"mismatch bf16 ({name})"

    print("KERNEL_OK")
</pallas_src>

<mosaic_0001>
module attributes {stable_mosaic.version = 11 : i64} {
  func.func @_tri_gating_kernel(%arg0: i32, %arg1: memref<24x88xf32, #tpu.memory_space<vmem>>, %arg2: memref<88x1152xf32, #tpu.memory_space<vmem>>, %arg3: memref<1x1152xf32, #tpu.memory_space<vmem>>, %arg4: memref<24x128xf32, #tpu.memory_space<vmem>>, %arg5: memref<24x128xf32, #tpu.memory_space<vmem>>, %arg6: memref<24x128xf32, #tpu.memory_space<vmem>>) attributes {dimension_semantics = [#tpu.dimension_semantics<parallel>], iteration_bounds = array<i64: 1>, scalar_prefetch = 0 : i64, scratch_operands = 0 : i64, tpu.core_type = #tpu.core_type<tc>, window_params = [{transform_indices = @transform_0, window_bounds = array<i64: 24, 88>}, {pipeline_mode = #tpu.pipeline_mode<synchronous>, transform_indices = @transform_1, window_bounds = array<i64: 88, 1152>}, {pipeline_mode = #tpu.pipeline_mode<synchronous>, transform_indices = @transform_2, window_bounds = array<i64: 1, 1152>}, {transform_indices = @transform_3, window_bounds = array<i64: 24, 128>}, {transform_indices = @transform_4, window_bounds = array<i64: 24, 128>}, {transform_indices = @transform_5, window_bounds = array<i64: 24, 128>}]} {
    %c0 = arith.constant 0 : index
    %c0_0 = arith.constant 0 : index
    %0 = vector.load %arg1[%c0, %c0_0] : memref<24x88xf32, #tpu.memory_space<vmem>>, vector<24x88xf32>
    %c0_1 = arith.constant 0 : index
    %c0_2 = arith.constant 0 : index
    %1 = vector.load %arg2[%c0_1, %c0_2] : memref<88x1152xf32, #tpu.memory_space<vmem>>, vector<88x1152xf32>
    %cst = arith.constant dense<0.000000e+00> : vector<24x1152xf32>
    %2 = tpu.matmul %0, %1, %cst {dimension_numbers = #tpu.dot_dimension_numbers<[1], [0], [0], [1], [0, 0, 1, 1], [], []>} : vector<24x88xf32>, vector<88x1152xf32>, vector<24x1152xf32> -> vector<24x1152xf32>
    %c0_3 = arith.constant 0 : index
    %c0_4 = arith.constant 0 : index
    %3 = vector.load %arg3[%c0_3, %c0_4] : memref<1x1152xf32, #tpu.memory_space<vmem>>, vector<1x1152xf32>
    %4 = vector.broadcast %3 : vector<1x1152xf32> to vector<24x1152xf32>
    %5 = arith.addf %2, %4 : vector<24x1152xf32>
    %6 = vector.extract_strided_slice %5 {offsets = [0, 0], sizes = [24, 128], strides = [1, 1]} : vector<24x1152xf32> to vector<24x128xf32>
    %7 = math.tanh %6 : vector<24x128xf32>
    %8 = vector.extract_strided_slice %5 {offsets = [0, 128], sizes = [24, 128], strides = [1, 1]} : vector<24x1152xf32> to vector<24x128xf32>
    %9 = math.tanh %8 : vector<24x128xf32>
    %10 = vector.extract_strided_slice %5 {offsets = [0, 256], sizes = [24, 128], strides = [1, 1]} : vector<24x1152xf32> to vector<24x128xf32>
    %cst_5 = arith.constant 0.000000e+00 : f32
    %11 = vector.broadcast %cst_5 : f32 to vector<24x128xf32>
    %12 = arith.maximumf %10, %11 : vector<24x128xf32>
    %13 = arith.subf %7, %9 : vector<24x128xf32>
    %14 = arith.mulf %12, %13 : vector<24x128xf32>
    %15 = arith.addf %9, %14 : vector<24x128xf32>
    %c0_6 = arith.constant 0 : index
    %c0_7 = arith.constant 0 : index
    %16 = vector.load %arg4[%c0_6, %c0_7] : memref<24x128xf32, #tpu.memory_space<vmem>>, vector<24x128xf32>
    tpu.vector_store %arg4[%c0_6, %c0_7], %15 {strides = array<i32>} : memref<24x128xf32, #tpu.memory_space<vmem>>, vector<24x128xf32>,
    %17 = vector.extract_strided_slice %5 {offsets = [0, 384], sizes = [24, 128], strides = [1, 1]} : vector<24x1152xf32> to vector<24x128xf32>
    %18 = math.tanh %17 : vector<24x128xf32>
    %19 = vector.extract_strided_slice %5 {offsets = [0, 512], sizes = [24, 128], strides = [1, 1]} : vector<24x1152xf32> to vector<24x128xf32>
    %20 = math.tanh %19 : vector<24x128xf32>
    %21 = vector.extract_strided_slice %5 {offsets = [0, 640], sizes = [24, 128], strides = [1, 1]} : vector<24x1152xf32> to vector<24x128xf32>
    %cst_8 = arith.constant 0.000000e+00 : f32
    %22 = vector.broadcast %cst_8 : f32 to vector<24x128xf32>
    %23 = arith.maximumf %21, %22 : vector<24x128xf32>
    %24 = arith.subf %18, %20 : vector<24x128xf32>
    %25 = arith.mulf %23, %24 : vector<24x128xf32>
    %26 = arith.addf %20, %25 : vector<24x128xf32>
    %c0_9 = arith.constant 0 : index
    %c0_10 = arith.constant 0 : index
    %27 = vector.load %arg5[%c0_9, %c0_10] : memref<24x128xf32, #tpu.memory_space<vmem>>, vector<24x128xf32>
    tpu.vector_store %arg5[%c0_9, %c0_10], %26 {strides = array<i32>} : memref<24x128xf32, #tpu.memory_space<vmem>>, vector<24x128xf32>,
    %28 = vector.extract_strided_slice %5 {offsets = [0, 768], sizes = [24, 128], strides = [1, 1]} : vector<24x1152xf32> to vector<24x128xf32>
    %29 = math.tanh %28 : vector<24x128xf32>
    %30 = vector.extract_strided_slice %5 {offsets = [0, 896], sizes = [24, 128], strides = [1, 1]} : vector<24x1152xf32> to vector<24x128xf32>
    %31 = math.tanh %30 : vector<24x128xf32>
    %32 = vector.extract_strided_slice %5 {offsets = [0, 1024], sizes = [24, 128], strides = [1, 1]} : vector<24x1152xf32> to vector<24x128xf32>
    %cst_11 = arith.constant 0.000000e+00 : f32
    %33 = vector.broadcast %cst_11 : f32 to vector<24x128xf32>
    %34 = arith.maximumf %32, %33 : vector<24x128xf32>
    %35 = arith.subf %29, %31 : vector<24x128xf32>
    %36 = arith.mulf %34, %35 : vector<24x128xf32>
    %37 = arith.addf %31, %36 : vector<24x128xf32>
    %c0_12 = arith.constant 0 : index
    %c0_13 = arith.constant 0 : index
    %38 = vector.load %arg6[%c0_12, %c0_13] : memref<24x128xf32, #tpu.memory_space<vmem>>, vector<24x128xf32>
    tpu.vector_store %arg6[%c0_12, %c0_13], %37 {strides = array<i32>} : memref<24x128xf32, #tpu.memory_space<vmem>>, vector<24x128xf32>,
    return
  }
  func.func @transform_0(%arg0: i32) -> (i32, i32) {
    %c0_i32 = arith.constant 0 : i32
    %c0_i32_0 = arith.constant 0 : i32
    return %arg0, %c0_i32 : i32, i32
  }
  func.func @transform_1(%arg0: i32) -> (i32, i32) {
    %c0_i32 = arith.constant 0 : i32
    %c0_i32_0 = arith.constant 0 : i32
    %c0_i32_1 = arith.constant 0 : i32
    return %c0_i32, %c0_i32_0 : i32, i32
  }
  func.func @transform_2(%arg0: i32) -> (i32, i32) {
    %c0_i32 = arith.constant 0 : i32
    %c0_i32_0 = arith.constant 0 : i32
    %c0_i32_1 = arith.constant 0 : i32
    return %c0_i32, %c0_i32_0 : i32, i32
  }
  func.func @transform_3(%arg0: i32) -> (i32, i32) {
    %c0_i32 = arith.constant 0 : i32
    %c0_i32_0 = arith.constant 0 : i32
    return %arg0, %c0_i32 : i32, i32
  }
  func.func @transform_4(%arg0: i32) -> (i32, i32) {
    %c0_i32 = arith.constant 0 : i32
    %c0_i32_0 = arith.constant 0 : i32
    return %arg0, %c0_i32 : i32, i32
  }
  func.func @transform_5(%arg0: i32) -> (i32, i32) {
    %c0_i32 = arith.constant 0 : i32
    %c0_i32_0 = arith.constant 0 : i32
    return %arg0, %c0_i32 : i32, i32
  }
}

module attributes {stable_mosaic.version = 11 : i64} {
  func.func @_tri_gating_kernel(%arg0: i32, %arg1: memref<24x88xf32, #tpu.memory_space<vmem>>, %arg2: memref<88x1152xf32, #tpu.memory_space<vmem>>, %arg3: memref<1x1152xf32, #tpu.memory_space<vmem>>, %arg4: memref<24x128xf32, #tpu.memory_space<vmem>>, %arg5: memref<24x128xf32, #tpu.memory_space<vmem>>, %arg6: memref<24x128xf32, #tpu.memory_space<vmem>>) attributes {dimension_semantics = [#tpu.dimension_semantics<parallel>], iteration_bounds = array<i64: 1>, scalar_prefetch = 0 : i64, scratch_operands = 0 : i64, tpu.core_type = #tpu.core_type<tc>, window_params = [{transform_indices = @transform_0, window_bounds = array<i64: 24, 88>}, {pipeline_mode = #tpu.pipeline_mode<synchronous>, transform_indices = @transform_1, window_bounds = array<i64: 88, 1152>}, {pipeline_mode = #tpu.pipeline_mode<synchronous>, transform_indices = @transform_2, window_bounds = array<i64: 1, 1152>}, {transform_indices = @transform_3, window_bounds = array<i64: 24, 128>}, {transform_indices = @transform_4, window_bounds = array<i64: 24, 128>}, {transform_indices = @transform_5, window_bounds = array<i64: 24, 128>}]} {
    %c0 = arith.constant 0 : index
    %c0_0 = arith.constant 0 : index
    %0 = vector.load %arg1[%c0, %c0_0] : memref<24x88xf32, #tpu.memory_space<vmem>>, vector<24x88xf32>
    %c0_1 = arith.constant 0 : index
    %c0_2 = arith.constant 0 : index
    %1 = vector.load %arg2[%c0_1, %c0_2] : memref<88x1152xf32, #tpu.memory_space<vmem>>, vector<88x1152xf32>
    %cst = arith.constant dense<0.000000e+00> : vector<24x1152xf32>
    %2 = tpu.matmul %0, %1, %cst {dimension_numbers = #tpu.dot_dimension_numbers<[1], [0], [0], [1], [0, 0, 1, 1], [], []>} : vector<24x88xf32>, vector<88x1152xf32>, vector<24x1152xf32> -> vector<24x1152xf32>
    %c0_3 = arith.constant 0 : index
    %c0_4 = arith.constant 0 : index
    %3 = vector.load %arg3[%c0_3, %c0_4] : memref<1x1152xf32, #tpu.memory_space<vmem>>, vector<1x1152xf32>
    %4 = vector.broadcast %3 : vector<1x1152xf32> to vector<24x1152xf32>
    %5 = arith.addf %2, %4 : vector<24x1152xf32>
    %6 = vector.extract_strided_slice %5 {offsets = [0, 0], sizes = [24, 128], strides = [1, 1]} : vector<24x1152xf32> to vector<24x128xf32>
    %7 = math.tanh %6 : vector<24x128xf32>
    %8 = vector.extract_strided_slice %5 {offsets = [0, 128], sizes = [24, 128], strides = [1, 1]} : vector<24x1152xf32> to vector<24x128xf32>
    %9 = math.tanh %8 : vector<24x128xf32>
    %10 = vector.extract_strided_slice %5 {offsets = [0, 256], sizes = [24, 128], strides = [1, 1]} : vector<24x1152xf32> to vector<24x128xf32>
    %cst_5 = arith.constant 0.000000e+00 : f32
    %11 = vector.broadcast %cst_5 : f32 to vector<24x128xf32>
    %12 = arith.maximumf %10, %11 : vector<24x128xf32>
    %13 = arith.subf %7, %9 : vector<24x128xf32>
    %14 = arith.mulf %12, %13 : vector<24x128xf32>
    %15 = arith.addf %9, %14 : vector<24x128xf32>
    %c0_6 = arith.constant 0 : index
    %c0_7 = arith.constant 0 : index
    %16 = vector.load %arg4[%c0_6, %c0_7] : memref<24x128xf32, #tpu.memory_space<vmem>>, vector<24x128xf32>
    tpu.vector_store %arg4[%c0_6, %c0_7], %15 {strides = array<i32>} : memref<24x128xf32, #tpu.memory_space<vmem>>, vector<24x128xf32>,
    %17 = vector.extract_strided_slice %5 {offsets = [0, 384], sizes = [24, 128], strides = [1, 1]} : vector<24x1152xf32> to vector<24x128xf32>
    %18 = math.tanh %17 : vector<24x128xf32>
    %19 = vector.extract_strided_slice %5 {offsets = [0, 512], sizes = [24, 128], strides = [1, 1]} : vector<24x1152xf32> to vector<24x128xf32>
    %20 = math.tanh %19 : vector<24x128xf32>
    %21 = vector.extract_strided_slice %5 {offsets = [0, 640], sizes = [24, 128], strides = [1, 1]} : vector<24x1152xf32> to vector<24x128xf32>
    %cst_8 = arith.constant 0.000000e+00 : f32
    %22 = vector.broadcast %cst_8 : f32 to vector<24x128xf32>
    %23 = arith.maximumf %21, %22 : vector<24x128xf32>
    %24 = arith.subf %18, %20 : vector<24x128xf32>
    %25 = arith.mulf %23, %24 : vector<24x128xf32>
    %26 = arith.addf %20, %25 : vector<24x128xf32>
    %c0_9 = arith.constant 0 : index
    %c0_10 = arith.constant 0 : index
    %27 = vector.load %arg5[%c0_9, %c0_10] : memref<24x128xf32, #tpu.memory_space<vmem>>, vector<24x128xf32>
    tpu.vector_store %arg5[%c0_9, %c0_10], %26 {strides = array<i32>} : memref<24x128xf32, #tpu.memory_space<vmem>>, vector<24x128xf32>,
    %28 = vector.extract_strided_slice %5 {offsets = [0, 768], sizes = [24, 128], strides = [1, 1]} : vector<24x1152xf32> to vector<24x128xf32>
    %29 = math.tanh %28 : vector<24x128xf32>
    %30 = vector.extract_strided_slice %5 {offsets = [0, 896], sizes = [24, 128], strides = [1, 1]} : vector<24x1152xf32> to vector<24x128xf32>
    %31 = math.tanh %30 : vector<24x128xf32>
    %32 = vector.extract_strided_slice %5 {offsets = [0, 1024], sizes = [24, 128], strides = [1, 1]} : vector<24x1152xf32> to vector<24x128xf32>
    %cst_11 = arith.constant 0.000000e+00 : f32
    %33 = vector.broadcast %cst_11 : f32 to vector<24x128xf32>
    %34 = arith.maximumf %32, %33 : vector<24x128xf32>
    %35 = arith.subf %29, %31 : vector<24x128xf32>
    %36 = arith.mulf %34, %35 : vector<24x128xf32>
    %37 = arith.addf %31, %36 : vector<24x128xf32>
    %c0_12 = arith.constant 0 : index
    %c0_13 = arith.constant 0 : index
    %38 = vector.load %arg6[%c0_12, %c0_13] : memref<24x128xf32, #tpu.memory_space<vmem>>, vector<24x128xf32>
    tpu.vector_store %arg6[%c0_12, %c0_13], %37 {strides = array<i32>} : memref<24x128xf32, #tpu.memory_space<vmem>>, vector<24x128xf32>,
    return
  }
  func.func @transform_0(%arg0: i32) -> (i32, i32) {
    %c0_i32 = arith.constant 0 : i32
    %c0_i32_0 = arith.constant 0 : i32
    return %arg0, %c0_i32 : i32, i32
  }
  func.func @transform_1(%arg0: i32) -> (i32, i32) {
    %c0_i32 = arith.constant 0 : i32
    %c0_i32_0 = arith.constant 0 : i32
    %c0_i32_1 = arith.constant 0 : i32
    return %c0_i32, %c0_i32_0 : i32, i32
  }
  func.func @transform_2(%arg0: i32) -> (i32, i32) {
    %c0_i32 = arith.constant 0 : i32
    %c0_i32_0 = arith.constant 0 : i32
    %c0_i32_1 = arith.constant 0 : i32
    return %c0_i32, %c0_i32_0 : i32, i32
  }
  func.func @transform_3(%arg0: i32) -> (i32, i32) {
    %c0_i32 = arith.constant 0 : i32
    %c0_i32_0 = arith.constant 0 : i32
    return %arg0, %c0_i32 : i32, i32
  }
  func.func @transform_4(%arg0: i32) -> (i32, i32) {
    %c0_i32 = arith.constant 0 : i32
    %c0_i32_0 = arith.constant 0 : i32
    return %arg0, %c0_i32 : i32, i32
  }
  func.func @transform_5(%arg0: i32) -> (i32, i32) {
    %c0_i32 = arith.constant 0 : i32
    %c0_i32_0 = arith.constant 0 : i32
    return %arg0, %c0_i32 : i32, i32
  }
}

</mosaic_0001>

<bundles_post_ra>
// kernel: _tri_gating_impl.1
= control target key start
LH: loop header
LB: loop body
LE: loop exit
PB: predicated region body
PF: predicated region fallthrough
CT: control target
= control target key end

     0   :  { %11 = vsyncpa [#allocation3], 0  ;;  %s1167_s0 = inlined_call_operand.hbm [shape: f32[24,88], index: 0, kind: input, shape index: {}]   ;;  %s1168_s1 = inlined_call_operand.hbm [shape: f32[88,1152], index: 1, kind: input, shape index: {}]   ;;  %s1169_s2 = inlined_call_operand.hbm [shape: f32[1,1152], index: 2, kind: input, shape index: {}]   ;;  %s1170_s3 = inlined_call_operand.hbm [shape: f32[24,128], index: 3, kind: output, shape index: {0}]   ;;  %s1171_s4 = inlined_call_operand.hbm [shape: f32[24,128], index: 4, kind: output, shape index: {1}]   ;;  %s1172_s5 = inlined_call_operand.hbm [shape: f32[24,128], index: 5, kind: output, shape index: {2}]  }
   0x1   :  { %12 = vsyncpa [#allocation6], 0 }
   0x2   :  { %13 = vsyncpa [#allocation4], 0 }
   0x3   :  { %14 = vsyncpa [#allocation10], 0  ;;  %s1002_s18 = smov [#allocation5]  }
   0x4   :  { %s32_s19 = sshll.u32 %s1002_s18, 4  ;;  %s33_s19 = int_to_ptr.vmem [resolvable:$true] %s32_s19 }
   0x5   :  { %s882_s20 = scalar_lea.vmem %s33_s19, 12672  ;;  %p887_p1 = scmp.lt.s32.totalorder %s33_s19, %s33_s19 }
   0x6   :  { %p883_p0 = scmp.ne.s32.totalorder %s33_s19, %s882_s20  ;;  %p888_p2 = scmp.lt.s32.totalorder %s882_s20, %s882_s20 }
   0x8   :  { %p889_p3 = por %p888_p2, %p887_p1 }
   0xa   :  { %p890_p4 = pnand %p889_p3, %p883_p0 }
   0xc   :  { %893 = shalt.err (!%p890_p4)
}
   0xd   :  { %s1003_s21 = smov 1152   ;;  %s1004_s22 = smov 72  }
   0xe   :  { %38 = dma.hbm_to_vmem [thread:$0]  %s1168_s1, 12672, %s33_s19, [#allocation6], %s1003_s21, %s1003_s21, %s1004_s22  }
   0xf   :  { %s1005_s25 = smov [#allocation2]  }
  0x10   :  { %s20_s26 = sshll.u32 %s1005_s25, 4  ;;  %s21_s26 = int_to_ptr.vmem [resolvable:$true] %s20_s26 }
  0x11   :  { %s902_s27 = scalar_lea.vmem %s21_s26, 384  ;;  %p907_p6 = scmp.lt.s32.totalorder %s21_s26, %s21_s26 }
  0x12   :  { %p903_p5 = scmp.ne.s32.totalorder %s21_s26, %s902_s27  ;;  %p908_p7 = scmp.lt.s32.totalorder %s902_s27, %s902_s27 }
  0x14   :  { %p909_p8 = por %p908_p7, %p907_p6 }
  0x16   :  { %p910_p9 = pnand %p909_p8, %p903_p5 }
  0x18   :  { %913 = shalt.err (!%p910_p9)
}
  0x19   :  { %s1006_s28 = smov 128   ;;  %s1007_s29 = smov 8  }
  0x1a   :  { %26 = dma.hbm_to_vmem [thread:$0]  %s1167_s0, 384, %s21_s26, [#allocation3], %s1006_s28, %s1006_s28, %s1007_s29  }
  0x1b   :  { %s1008_s1 = smov [#allocation7]  }
  0x1c   :  { %s45_s7 = sshll.u32 %s1008_s1, 4  ;;  %s46_s7 = int_to_ptr.vmem [resolvable:$true] %s45_s7 }
  0x1d   :  { %s922_s8 = scalar_lea.vmem %s46_s7, 144  ;;  %s926_s9 = scalar_lea.vmem %s46_s7, 160 }
  0x1e   :  { %p923_p10 = scmp.ne.s32.totalorder %s46_s7, %s922_s8  ;;  %p927_p11 = scmp.lt.s32.totalorder %s46_s7, %s46_s7 }
  0x1f   :  { %p928_p12 = scmp.lt.s32.totalorder %s926_s9, %s922_s8 }
  0x21   :  { %p929_p13 = por %p928_p12, %p927_p11 }
  0x23   :  { %p930_p0 = pnand %p929_p13, %p923_p10 }
  0x25   :  { %933 = shalt.err (!%p930_p0)
}
  0x26   :  { %48 = dma.hbm_to_vmem [thread:$0]  %s1169_s2, 144, %s46_s7, [#allocation6]  }
  0x27   :  { %994 = dma.done.wait [#allocation3], 384  }
  0x28   :  { %995 = vsyncadd [#allocation3], 4294966912 }
  0x29   :  { %996 = dma.done.wait [#allocation6], 12816  }
  0x2a   :  { %997 = vsyncadd [#allocation6], 4294954480  ;;  %v1009_v0 = vmov 0.0   ;;  %v152_v1 = vld [vmem:[#allocation5 + $0x2d8] sm:$0xff]  ;;  %v154_v2 = vld [vmem:[#allocation5 + $0x2e8] sm:$0xff]  ;;  %vm209_vm0 = vcmask 719872  }
  0x2b   :  { %283 = vmatprep.mubr.f32.mxu0 %v1009_v0  ;;  %366 = vmatprep.mubr.f32.mxu1 %v1009_v0  ;;  %v151_v3 = vld [vmem:[#allocation5 + $0x2d0] sm:$0xff]  ;;  %v153_v4 = vld [vmem:[#allocation5 + $0x2e0] sm:$0xff]  ;;  %v142_v7 = vld [vmem:[#allocation5 + $0x288] sm:$0xff]  ;;  %vm1010_vm1 = vmmov 0   ;;  %s1011_s0 = smov [#allocation8]  }
  0x2c   :  { %229 = vmatprep.subr.mxu0 %v152_v1  ;;  %312 = vmatprep.subr.mxu1 %v154_v2  ;;  %v143_v5 = vld [vmem:[#allocation5 + $0x290] sm:$0xff]  ;;  %v145_v6 = vld [vmem:[#allocation5 + $0x2a0] sm:$0xff]  ;;  %v144_v8 = vld [vmem:[#allocation5 + $0x298] sm:$0xff]  ;;  %s699_s2 = sshll.u32 %s1011_s0, 4  ;;  %s700_s2 = int_to_ptr.vmem [resolvable:$true] %s699_s2 }
  0x2d   :  { %230 = vmatpush1.msra.mxu0 %v151_v3  ;;  %313 = vmatpush1.msra.mxu1 %v153_v4  ;;  %v134_v9 = vld [vmem:[#allocation5 + $0x248] sm:$0xff]  ;;  %v136_v10 = vld [vmem:[#allocation5 + $0x258] sm:$0xff]  ;;  %v133_v11 = vld [vmem:[#allocation5 + $0x240] sm:$0xff]  ;;  %s934_s12 = scalar_lea.vmem %s700_s2, 384  ;;  %p939_p2 = scmp.lt.s32.totalorder %s700_s2, %s700_s2 }
  0x2e   :  { %231 = vmatprep.subr.mxu0 %v143_v5  ;;  %314 = vmatprep.subr.mxu1 %v145_v6  ;;  %v135_v12 = vld [vmem:[#allocation5 + $0x250] sm:$0xff]  ;;  %v125_v13 = vld [vmem:[#allocation5 + $0x200] sm:$0xff]  ;;  %v124_v15 = vld [vmem:[#allocation5 + $0x1f8] sm:$0xff]  ;;  %p935_p1 = scmp.ne.s32.totalorder %s700_s2, %s934_s12  ;;  %p940_p3 = scmp.lt.s32.totalorder %s934_s12, %s934_s12 }
  0x2f   :  { %232 = vmatpush1.msra.mxu0 %v142_v7  ;;  %315 = vmatpush1.msra.mxu1 %v144_v8  ;;  %v127_v14 = vld [vmem:[#allocation5 + $0x210] sm:$0xff]  ;;  %v126_v16 = vld [vmem:[#allocation5 + $0x208] sm:$0xff]  ;;  %v116_v17 = vld [vmem:[#allocation5 + $0x1b8] sm:$0xff] }
  0x30   :  { %233 = vmatprep.subr.mxu0 %v134_v9  ;;  %316 = vmatprep.subr.mxu1 %v136_v10  ;;  %v118_v18 = vld [vmem:[#allocation5 + $0x1c8] sm:$0xff]  ;;  %v115_v19 = vld [vmem:[#allocation5 + $0x1b0] sm:$0xff]  ;;  %v117_v20 = vld [vmem:[#allocation5 + $0x1c0] sm:$0xff]  ;;  %p941_p4 = por %p940_p3, %p939_p2 }
  0x31   :  { %234 = vmatpush1.msra.mxu0 %v133_v11  ;;  %317 = vmatpush1.msra.mxu1 %v135_v12  ;;  %v107_v21 = vld [vmem:[#allocation5 + $0x170] sm:$0xff]  ;;  %v109_v22 = vld [vmem:[#allocation5 + $0x180] sm:$0xff]  ;;  %v106_v23 = vld [vmem:[#allocation5 + $0x168] sm:$0xff] }
  0x32   :  { %235 = vmatprep.subr.mxu0 %v125_v13  ;;  %318 = vmatprep.subr.mxu1 %v127_v14  ;;  %v108_v24 = vld [vmem:[#allocation5 + $0x178] sm:$0xff]  ;;  %v98_v25 = vld [vmem:[#allocation5 + $0x128] sm:$0xff]  ;;  %v97_v27 = vld [vmem:[#allocation5 + $0x120] sm:$0xff]  ;;  %p942_p5 = pnand %p941_p4, %p935_p1 }
  0x33   :  { %236 = vmatpush1.msra.mxu0 %v124_v15  ;;  %319 = vmatpush1.msra.mxu1 %v126_v16  ;;  %v100_v26 = vld [vmem:[#allocation5 + $0x138] sm:$0xff]  ;;  %v99_v28 = vld [vmem:[#allocation5 + $0x130] sm:$0xff]  ;;  %v89_v29 = vld [vmem:[#allocation5 + $0xe0] sm:$0xff] }
  0x34   :  { %237 = vmatprep.subr.mxu0 %v116_v17  ;;  %320 = vmatprep.subr.mxu1 %v118_v18  ;;  %v91_v30 = vld [vmem:[#allocation5 + $0xf0] sm:$0xff]  ;;  %v88_v31 = vld [vmem:[#allocation5 + $0xd8] sm:$0xff]  ;;  %v90_v32 = vld [vmem:[#allocation5 + $0xe8] sm:$0xff] }
  0x35   :  { %238 = vmatpush1.msra.mxu0 %v115_v19  ;;  %321 = vmatpush1.msra.mxu1 %v117_v20  ;;  %v80_v33 = vld [vmem:[#allocation5 + $0x98] sm:$0xff]  ;;  %v82_v34 = vld [vmem:[#allocation5 + $0xa8] sm:$0xff]  ;;  %v79_v35 = vld [vmem:[#allocation5 + $0x90] sm:$0xff] }
  0x36   :  { %239 = vmatprep.subr.mxu0 %v107_v21  ;;  %322 = vmatprep.subr.mxu1 %v109_v22  ;;  %v81_v36 = vld [vmem:[#allocation5 + $0xa0] sm:$0xff]  ;;  %v71_v37 = vld [vmem:[#allocation5 + $0x50] sm:$0xff]  ;;  %v70_v39 = vld [vmem:[#allocation5 + $0x48] sm:$0xff] }
  0x37   :  { %240 = vmatpush1.msra.mxu0 %v106_v23  ;;  %323 = vmatpush1.msra.mxu1 %v108_v24  ;;  %v73_v38 = vld [vmem:[#allocation5 + $0x60] sm:$0xff]  ;;  %v72_v40 = vld [vmem:[#allocation5 + $0x58] sm:$0xff]  ;;  %v62_v41 = vld [vmem:[#allocation5 + $0x8] sm:$0xff] }
  0x38   :  { %241 = vmatprep.subr.mxu0 %v98_v25  ;;  %324 = vmatprep.subr.mxu1 %v100_v26  ;;  %v64_v42 = vld [vmem:[#allocation5 + $0x18] sm:$0xff]  ;;  %v61_v43 = vld [vmem:[#allocation5] sm:$0xff]  ;;  %v63_v44 = vld [vmem:[#allocation5 + $0x10] sm:$0xff] }
  0x39   :  { %242 = vmatpush1.msra.mxu0 %v97_v27  ;;  %325 = vmatpush1.msra.mxu1 %v99_v28  ;;  %v1058_v45 = vld [vmem:[#allocation2] sm:$0xff]  ;;  %v156_v46 = vld [vmem:[#allocation5 + $0x2f8] sm:$0xff]  ;;  %v155_v48 = vld [vmem:[#allocation5 + $0x2f0] sm:$0xff] }
  0x3a   :  { %243 = vmatprep.subr.mxu0 %v89_v29  ;;  %326 = vmatprep.subr.mxu1 %v91_v30  ;;  %v158_v47 = vld [vmem:[#allocation5 + $0x308] sm:$0xff]  ;;  %v157_v49 = vld [vmem:[#allocation5 + $0x300] sm:$0xff]  ;;  %v147_v50 = vld [vmem:[#allocation5 + $0x2b0] sm:$0xff] }
  0x3b   :  { %244 = vmatpush1.msra.mxu0 %v88_v31  ;;  %327 = vmatpush1.msra.mxu1 %v90_v32  ;;  %v149_v51 = vld [vmem:[#allocation5 + $0x2c0] sm:$0xff]  ;;  %v146_v52 = vld [vmem:[#allocation5 + $0x2a8] sm:$0xff]  ;;  %v148_v53 = vld [vmem:[#allocation5 + $0x2b8] sm:$0xff] }
  0x3c   :  { %245 = vmatprep.subr.mxu0 %v80_v33  ;;  %328 = vmatprep.subr.mxu1 %v82_v34  ;;  %v1064_v54 = vld [vmem:[#allocation2 + $0x8] sm:$0xff]  ;;  %v138_v55 = vld [vmem:[#allocation5 + $0x268] sm:$0xff]  ;;  %v140_v56 = vld [vmem:[#allocation5 + $0x278] sm:$0xff] }
  0x3d   :  { %246 = vmatpush1.msra.mxu0 %v79_v35  ;;  %329 = vmatpush1.msra.mxu1 %v81_v36  ;;  %v137_v57 = vld [vmem:[#allocation5 + $0x260] sm:$0xff]  ;;  %v139_v58 = vld [vmem:[#allocation5 + $0x270] sm:$0xff]  ;;  %v128_v61 = vld [vmem:[#allocation5 + $0x218] sm:$0xff] }
  0x3e   :  { %247 = vmatprep.subr.mxu0 %v71_v37  ;;  %330 = vmatprep.subr.mxu1 %v73_v38  ;;  %v129_v59 = vld [vmem:[#allocation5 + $0x220] sm:$0xff]  ;;  %v131_v60 = vld [vmem:[#allocation5 + $0x230] sm:$0xff]  ;;  %v130_v62 = vld [vmem:[#allocation5 + $0x228] sm:$0xff] }
  0x3f   :  { %248 = vmatpush1.msra.mxu0 %v70_v39  ;;  %331 = vmatpush1.msra.mxu1 %v72_v40  ;;  %v1069_v63 = vld [vmem:[#allocation2 + $0x10] sm:$0xff]  ;;  %v122_v2 = vld [vmem:[#allocation5 + $0x1e8] sm:$0xff]  ;;  %v119_v3 = vld [vmem:[#allocation5 + $0x1d0] sm:$0xff]  ;;  %v164_v40 = vlaneseq }
  0x40   :  { %249 = vmatprep.subr.mxu0 %v62_v41  ;;  %332 = vmatprep.subr.mxu1 %v64_v42  ;;  %v120_v1 = vld [vmem:[#allocation5 + $0x1d8] sm:$0xff]  ;;  %v121_v4 = vld [vmem:[#allocation5 + $0x1e0] sm:$0xff]  ;;  %v111_v5 = vld [vmem:[#allocation5 + $0x190] sm:$0xff] }
  0x41   :  { %250 = vmatpush1.msra.mxu0 %v61_v43  ;;  %333 = vmatpush1.msra.mxu1 %v63_v44  ;;  %v113_v6 = vld [vmem:[#allocation5 + $0x1a0] sm:$0xff]  ;;  %v110_v7 = vld [vmem:[#allocation5 + $0x188] sm:$0xff]  ;;  %v112_v8 = vld [vmem:[#allocation5 + $0x198] sm:$0xff]  ;;  %v1129_v41 = vshrl.u32 %v164_v40, 7 }
  0x42   :  { %744 = vmatmul.mubr.msk.f32.vlgmr.msra.gmra.mxu0 %vm209_vm0, %v1058_v45  ;;  %747 = vmatmul.mubr.msk.f32.vlgmr.msra.gmra.mxu1 %vm209_vm0, %v1058_v45  ;;  %v102_v9 = vld [vmem:[#allocation5 + $0x148] sm:$0xff]  ;;  %v104_v10 = vld [vmem:[#allocation5 + $0x158] sm:$0xff]  ;;  %v101_v11 = vld [vmem:[#allocation5 + $0x140] sm:$0xff] }
  0x43   :  { %395 = vmatprep.subr.mxu0 %v156_v46  ;;  %478 = vmatprep.subr.mxu1 %v158_v47  ;;  %v103_v12 = vld [vmem:[#allocation5 + $0x150] sm:$0xff]  ;;  %v93_v13 = vld [vmem:[#allocation5 + $0x100] sm:$0xff]  ;;  %v92_v15 = vld [vmem:[#allocation5 + $0xf8] sm:$0xff]  ;;  %v166_v42 = vsub.s32 0, %v1129_v41  ;;  %v170_v44 = vsub.s32 1, %v1129_v41 }
  0x44   :  { %396 = vmatpush1.msra.mxu0 %v155_v48  ;;  %479 = vmatpush1.msra.mxu1 %v157_v49  ;;  %v95_v14 = vld [vmem:[#allocation5 + $0x110] sm:$0xff]  ;;  %v94_v16 = vld [vmem:[#allocation5 + $0x108] sm:$0xff]  ;;  %v84_v17 = vld [vmem:[#allocation5 + $0xb8] sm:$0xff] }
  0x45   :  { %397 = vmatprep.subr.mxu0 %v147_v50  ;;  %480 = vmatprep.subr.mxu1 %v149_v51  ;;  %v86_v18 = vld [vmem:[#allocation5 + $0xc8] sm:$0xff]  ;;  %v83_v19 = vld [vmem:[#allocation5 + $0xb0] sm:$0xff]  ;;  %v85_v20 = vld [vmem:[#allocation5 + $0xc0] sm:$0xff] }
  0x46   :  { %289 = vmatprep.mubr.f32.mxu0 %v1009_v0  ;;  %398 = vmatpush1.msra.mxu0 %v146_v52  ;;  %v75_v21 = vld [vmem:[#allocation5 + $0x70] sm:$0xff]  ;;  %v77_v22 = vld [vmem:[#allocation5 + $0x80] sm:$0xff]  ;;  %v74_v23 = vld [vmem:[#allocation5 + $0x68] sm:$0xff]  ;;  %v174_v52 = vsub.s32 2, %v1129_v41 }
  0x47   :  { %481 = vmatpush1.msra.mxu1 %v148_v53  ;;  %745 = vmatmul.mubr.msk.f32.gmra.mxu0 %vm209_vm0, %v1064_v54  ;;  %v76_v24 = vld [vmem:[#allocation5 + $0x78] sm:$0xff]  ;;  %v66_v25 = vld [vmem:[#allocation5 + $0x28] sm:$0xff]  ;;  %v65_v27 = vld [vmem:[#allocation5 + $0x20] sm:$0xff] }
  0x48   :  { %399 = vmatprep.subr.mxu0 %v138_v55  ;;  %482 = vmatprep.subr.mxu1 %v140_v56  ;;  %v68_v26 = vld [vmem:[#allocation5 + $0x38] sm:$0xff]  ;;  %v67_v28 = vld [vmem:[#allocation5 + $0x30] sm:$0xff]  ;;  %v150_v30 = vld [vmem:[#allocation5 + $0x2c8] sm:$0xff] }
  0x49   :  { %400 = vmatpush1.msra.mxu0 %v137_v57  ;;  %483 = vmatpush1.msra.mxu1 %v139_v58  ;;  %v159_v29 = vld [vmem:[#allocation5 + $0x310] sm:$0xff]  ;;  %v141_v31 = vld [vmem:[#allocation5 + $0x280] sm:$0xff]  ;;  %v132_v32 = vld [vmem:[#allocation5 + $0x238] sm:$0xff] }
  0x4a   :  { %401 = vmatprep.subr.mxu0 %v129_v59  ;;  %484 = vmatprep.subr.mxu1 %v131_v60  ;;  %v123_v33 = vld [vmem:[#allocation5 + $0x1f0] sm:$0xff]  ;;  %v114_v34 = vld [vmem:[#allocation5 + $0x1a8] sm:$0xff]  ;;  %v105_v35 = vld [vmem:[#allocation5 + $0x160] sm:$0xff] }
  0x4b   :  { %295 = vmatprep.mubr.f32.mxu0 %v1009_v0  ;;  %402 = vmatpush1.msra.mxu0 %v128_v61  ;;  %v96_v36 = vld [vmem:[#allocation5 + $0x118] sm:$0xff]  ;;  %v87_v37 = vld [vmem:[#allocation5 + $0xd0] sm:$0xff]  ;;  %v78_v38 = vld [vmem:[#allocation5 + $0x88] sm:$0xff] }
  0x4c   :  { %485 = vmatpush1.msra.mxu1 %v130_v62  ;;  %746 = vmatmul.mubr.msk.f32.gmra.mxu0 %vm209_vm0, %v1069_v63  ;;  %v69_v39 = vld [vmem:[#allocation5 + $0x40] sm:$0xff]  ;;  %v1132_v43 = vld [vmem:[#allocation7] sm:$0xff] }
  0x4d   :  { %403 = vmatprep.subr.mxu0 %v120_v1  ;;  %486 = vmatprep.subr.mxu1 %v122_v2  ;;  %v167_v46 = vrot.slane %v1132_v43, %v166_v42  ;;  %v175_v57 = vrot.slane %v1132_v43, %v174_v52 }
  0x4e   :  { %404 = vmatpush1.msra.mxu0 %v119_v3  ;;  %487 = vmatpush1.msra.mxu1 %v121_v4  ;;  %v178_v3 = vsub.s32 3, %v1129_v41 }
  0x4f   :  { %405 = vmatprep.subr.mxu0 %v111_v5  ;;  %488 = vmatprep.subr.mxu1 %v113_v6 }
  0x50   :  { %406 = vmatpush1.msra.mxu0 %v110_v7  ;;  %489 = vmatpush1.msra.mxu1 %v112_v8 }
  0x51   :  { %372 = vmatprep.mubr.f32.mxu1 %v1009_v0  ;;  %407 = vmatprep.subr.mxu0 %v102_v9 }
  0x52   :  { %490 = vmatprep.subr.mxu1 %v104_v10  ;;  %748 = vmatmul.mubr.msk.f32.gmra.mxu1 %vm209_vm0, %v1064_v54  ;;  %v182_v10 = vsub.s32 4, %v1129_v41 }
  0x53   :  { %408 = vmatpush1.msra.mxu0 %v101_v11  ;;  %491 = vmatpush1.msra.mxu1 %v103_v12  ;;  %v179_v12 = vrot.slane %v1132_v43, %v178_v3 }
  0x54   :  { %409 = vmatprep.subr.mxu0 %v93_v13  ;;  %492 = vmatprep.subr.mxu1 %v95_v14 }
  0x55   :  { %410 = vmatpush1.msra.mxu0 %v92_v15  ;;  %493 = vmatpush1.msra.mxu1 %v94_v16 }
  0x56   :  { %378 = vmatprep.mubr.f32.mxu1 %v1009_v0  ;;  %411 = vmatprep.subr.mxu0 %v84_v17 }
  0x57   :  { %494 = vmatprep.subr.mxu1 %v86_v18  ;;  %749 = vmatmul.mubr.msk.f32.gmra.mxu1 %vm209_vm0, %v1069_v63 }
  0x58   :  { %412 = vmatpush1.msra.mxu0 %v83_v19  ;;  %495 = vmatpush1.msra.mxu1 %v85_v20  ;;  %v183_v19 = vrot.slane %v1132_v43, %v182_v10 }
  0x59   :  { %413 = vmatprep.subr.mxu0 %v75_v21  ;;  %496 = vmatprep.subr.mxu1 %v77_v22 }
  0x5a   :  { %414 = vmatpush1.msra.mxu0 %v74_v23  ;;  %497 = vmatpush1.msra.mxu1 %v76_v24  ;;  %v190_v23 = vsub.s32 6, %v1129_v41 }
  0x5b   :  { %415 = vmatprep.subr.mxu0 %v66_v25  ;;  %498 = vmatprep.subr.mxu1 %v68_v26 }
  0x5c   :  { %416 = vmatpush1.msra.mxu0 %v65_v27  ;;  %449 = vmatprep.mubr.f32.mxu0 %v1009_v0 }
  0x5d   :  { %499 = vmatpush1.msra.mxu1 %v67_v28  ;;  %532 = vmatprep.mubr.f32.mxu1 %v1009_v0  ;;  %v194_v28 = vsub.s32 7, %v1129_v41 }
  0x5e   :  { %750 = vmatmul.mubr.msk.f32.vlgmr.msra.gmra.mxu0 %vm209_vm0, %v1058_v45  ;;  %753 = vmatmul.mubr.msk.f32.vlgmr.msra.gmra.mxu1 %vm209_vm0, %v1058_v45 }
  0x5f   :  { %773 = vmatprep.subr.mxu0 %v1009_v0  ;;  %804 = vmatprep.subr.mxu1 %v1009_v0 }
  0x60   :  { %774 = vmatpush3.msra.mxu0 %v159_v29  ;;  %815 = vmatpush3.msra.mxu1 %v159_v29 }
  0x61   :  { %775 = vmatprep.subr.mxu0 %v1009_v0  ;;  %805 = vmatprep.subr.mxu1 %v1009_v0 }
  0x62   :  { %455 = vmatprep.mubr.f32.mxu0 %v1009_v0  ;;  %538 = vmatprep.mubr.f32.mxu1 %v1009_v0 }
  0x63   :  { %776 = vmatpush3.msra.mxu0 %v150_v30  ;;  %816 = vmatpush3.msra.mxu1 %v150_v30 }
  0x64   :  { %751 = vmatmul.mubr.msk.f32.gmra.mxu0 %vm209_vm0, %v1064_v54  ;;  %754 = vmatmul.mubr.msk.f32.gmra.mxu1 %vm209_vm0, %v1064_v54 }
  0x65   :  { %777 = vmatprep.subr.mxu0 %v1009_v0  ;;  %806 = vmatprep.subr.mxu1 %v1009_v0 }
  0x66   :  { %778 = vmatpush3.msra.mxu0 %v141_v31  ;;  %817 = vmatpush3.msra.mxu1 %v141_v31 }
  0x67   :  { %779 = vmatprep.subr.mxu0 %v1009_v0  ;;  %807 = vmatprep.subr.mxu1 %v1009_v0 }
  0x68   :  { %461 = vmatprep.mubr.f32.mxu0 %v1009_v0  ;;  %544 = vmatprep.mubr.f32.mxu1 %v1009_v0 }
  0x69   :  { %780 = vmatpush3.msra.mxu0 %v132_v32  ;;  %818 = vmatpush3.msra.mxu1 %v132_v32 }
  0x6a   :  { %752 = vmatmul.mubr.msk.f32.gmra.mxu0 %vm209_vm0, %v1069_v63  ;;  %755 = vmatmul.mubr.msk.f32.gmra.mxu1 %vm209_vm0, %v1069_v63 }
  0x6b   :  { %781 = vmatprep.subr.mxu0 %v1009_v0  ;;  %808 = vmatprep.subr.mxu1 %v1009_v0 }
  0x6c   :  { %782 = vmatpush3.msra.mxu0 %v123_v33  ;;  %819 = vmatpush3.msra.mxu1 %v123_v33 }
  0x6d   :  { %783 = vmatprep.subr.mxu0 %v1009_v0  ;;  %809 = vmatprep.subr.mxu1 %v1009_v0 }
  0x6e   :  { %784 = vmatpush3.msra.mxu0 %v114_v34  ;;  %820 = vmatpush3.msra.mxu1 %v114_v34 }
  0x6f   :  { %785 = vmatprep.subr.mxu0 %v1009_v0  ;;  %810 = vmatprep.subr.mxu1 %v1009_v0 }
  0x70   :  { %786 = vmatpush3.msra.mxu0 %v105_v35  ;;  %821 = vmatpush3.msra.mxu1 %v105_v35  ;;  %v191_v35 = vrot.slane %v1132_v43, %v190_v23 }
  0x71   :  { %787 = vmatprep.subr.mxu0 %v1009_v0  ;;  %811 = vmatprep.subr.mxu1 %v1009_v0 }
  0x72   :  { %788 = vmatpush3.msra.mxu0 %v96_v36  ;;  %822 = vmatpush3.msra.mxu1 %v96_v36 }
  0x73   :  { %789 = vmatprep.subr.mxu0 %v1009_v0  ;;  %812 = vmatprep.subr.mxu1 %v1009_v0 }
  0x74   :  { %790 = vmatpush3.msra.mxu0 %v87_v37  ;;  %823 = vmatpush3.msra.mxu1 %v87_v37  ;;  %v195_v37 = vrot.slane %v1132_v43, %v194_v28 }
  0x75   :  { %791 = vmatprep.subr.mxu0 %v1009_v0  ;;  %813 = vmatprep.subr.mxu1 %v1009_v0 }
  0x76   :  { %792 = vmatpush3.msra.mxu0 %v78_v38  ;;  %824 = vmatpush3.msra.mxu1 %v78_v38 }
  0x77   :  { %793 = vmatprep.subr.mxu0 %v1009_v0  ;;  %814 = vmatprep.subr.mxu1 %v1009_v0 }
  0x78   :  { %794 = vmatpush3.msra.mxu0 %v69_v39  ;;  %825 = vmatpush3.msra.mxu1 %v69_v39  ;;  %v186_v39 = vsub.s32 5, %v1129_v41 }
  0x79   :  { %795 = vmatprep.mubr.msk.f32.mxu0 %vm1010_vm1, %v1009_v0  ;;  %798 = vmatprep.mubr.msk.f32.mxu1 %vm1010_vm1, %v1009_v0 }
  0x7a   :  { %796 = vmatmul.mubr.msk.f32.vlgmr.msra.gmra.mxu0 %vm209_vm0, %v1058_v45  ;;  %799 = vmatmul.mubr.msk.f32.vlgmr.msra.gmra.mxu1 %vm209_vm0, %v1064_v54  ;;  %v171_v45 = vrot.slane %v1132_v43, %v170_v44 }
  0x7b   :  { %801 = vmatprep.mubr.msk.f32.mxu1 %vm1010_vm1, %v1009_v0 }
  0x7e   :  { %802 = vmatmul.mubr.msk.f32.gmra.mxu1 %vm209_vm0, %v1069_v63 }
 0x102   :  { %v285_v47 = vpop.f32.mrf.mxu0  ;;  %v368_v55 = vpop.f32.mrf.mxu1 }
 0x103   :  { %v286_v48 = vadd.f32 %v285_v47, %v167_v46  ;;  %v369_v62 = vadd.f32 %v368_v55, %v175_v57 }
 0x104   :  { %v287_v49 = vpop.f32.mrf.mxu0  ;;  %v370_v61 = vpop.f32.mrf.mxu1 }
 0x105   :  { %838 = vtanh.f32 %v286_v48  ;;  %v288_v0 = vadd.f32 %v287_v49, %v171_v45  ;;  %v637_v5 = vmax.f32 %v369_v62, 0.0  ;;  %v371_v21 = vadd.f32 %v370_v61, %v179_v12 }
 0x107   :  { %840 = vtanh.f32 %v288_v0  ;;  %v291_v50 = vpop.f32.mrf.mxu0 }
 0x108   :  { %v292_v51 = vadd.f32 %v291_v50, %v167_v46 }
 0x109   :  { %v293_v53 = vpop.f32.mrf.mxu0 }
 0x10a   :  { %842 = vtanh.f32 %v292_v51  ;;  %v294_v54 = vadd.f32 %v293_v53, %v171_v45 }
 0x10c   :  { %844 = vtanh.f32 %v294_v54  ;;  %v297_v56 = vpop.f32.mrf.mxu0 }
 0x10d   :  { %v298_v58 = vadd.f32 %v297_v56, %v167_v46 }
 0x10e   :  { %v299_v59 = vpop.f32.mrf.mxu0 }
 0x10f   :  { %846 = vtanh.f32 %v298_v58  ;;  %v300_v60 = vadd.f32 %v299_v59, %v171_v45 }
 0x111   :  { %848 = vtanh.f32 %v300_v60 }
 0x112   :  { %v839_v63 = vpop.eup %838  ;;  %v374_v1 = vpop.f32.mrf.mxu1  ;;  %850 = vtanh.f32 %v371_v21 }
 0x113   :  { %v375_v7 = vadd.f32 %v374_v1, %v175_v57 }
 0x114   :  { %v841_v2 = vpop.eup %840  ;;  %v376_v4 = vpop.f32.mrf.mxu1 }
 0x115   :  { %v640_v6 = vsub.f32 %v839_v63, %v841_v2  ;;  %v638_v15 = vmax.f32 %v375_v7, 0.0  ;;  %v377_v36 = vadd.f32 %v376_v4, %v179_v12 }
 0x117   :  { %v843_v8 = vpop.eup %842  ;;  %v380_v9 = vpop.f32.mrf.mxu1  ;;  %v643_v11 = vmul.f32 %v640_v6, %v637_v5 }
 0x118   :  { %v381_v18 = vadd.f32 %v380_v9, %v175_v57 }
 0x119   :  { %v845_v13 = vpop.eup %844  ;;  %v646_v14 = vadd.f32 %v841_v2, %v643_v11  ;;  %v382_v17 = vpop.f32.mrf.mxu1 }
 0x11a   :  { %v641_v16 = vsub.f32 %v843_v8, %v845_v13  ;;  %v639_v29 = vmax.f32 %v381_v18, 0.0  ;;  %v383_v40 = vadd.f32 %v382_v17, %v179_v12 }
 0x11b   :  { %649 = vst [vmem:[#allocation8] sm:$0xff] %v646_v14 }
 0x11c   :  { %v847_v20 = vpop.eup %846  ;;  %v644_v22 = vmul.f32 %v641_v16, %v638_v15 }
 0x11e   :  { %v849_v24 = vpop.eup %848  ;;  %v647_v25 = vadd.f32 %v845_v13, %v644_v22  ;;  %v451_v26 = vpop.f32.mrf.mxu0 }
 0x11f   :  { %v534_v27 = vpop.f32.mrf.mxu1  ;;  %v642_v30 = vsub.f32 %v847_v20, %v849_v24  ;;  %v452_v31 = vadd.f32 %v451_v26, %v183_v19 }
 0x120   :  { %650 = vst [vmem:[#allocation8 + $0x8] sm:$0xff] %v647_v25  ;;  %v453_v32 = vpop.f32.mrf.mxu0  ;;  %v535_v46 = vadd.f32 %v534_v27, %v191_v35 }
 0x121   :  { %v536_v33 = vpop.f32.mrf.mxu1  ;;  %v645_v34 = vmul.f32 %v642_v30, %v639_v29  ;;  %852 = vtanh.f32 %v452_v31 }
 0x122   :  { %854 = vtanh.f32 %v377_v36  ;;  %v537_v47 = vadd.f32 %v536_v33, %v195_v37 }
 0x123   :  { %v648_v38 = vadd.f32 %v849_v24, %v645_v34 }
 0x124   :  { %v457_v42 = vpop.f32.mrf.mxu0  ;;  %v540_v44 = vpop.f32.mrf.mxu1 }
 0x125   :  { %651 = vst [vmem:[#allocation8 + $0x10] sm:$0xff] %v648_v38  ;;  %v458_v45 = vadd.f32 %v457_v42, %v183_v19 }
 0x126   :  { %v459_v48 = vpop.f32.mrf.mxu0  ;;  %v542_v49 = vpop.f32.mrf.mxu1 }
 0x127   :  { %945 = shalt.err (!%p942_p5)
}
 0x128   :  { %705 = dma.vmem_to_hbm [thread:$0]  %s700_s2, 384, %s1170_s3, [#allocation4], %s1006_s28, %s1006_s28, %s1007_s29   ;;  %v187_v41 = vrot.slane %v1132_v43, %v186_v39  ;;  %856 = vtanh.f32 %v458_v45  ;;  %v541_v0 = vadd.f32 %v540_v44, %v191_v35  ;;  %v543_v50 = vadd.f32 %v542_v49, %v195_v37  ;;  %v851_v57 = vpop.eup %850  ;;  %v743_v12 = vld [vmem:[#allocation7 + $0x8] ss:$0 sm:$0xff] }
 0x129   :  { %858 = vtanh.f32 %v383_v40  ;;  %s1012_s3 = smov [#allocation9]   ;;  %s1013_s16 = smov [#allocation11]  }
 0x12a   :  { %860 = vtanh.f32 %v535_v46  ;;  %v463_v51 = vpop.f32.mrf.mxu0  ;;  %v546_v52 = vpop.f32.mrf.mxu1  ;;  %v454_v53 = vadd.f32 %v453_v32, %v187_v41  ;;  %v460_v62 = vadd.f32 %v459_v48, %v187_v41  ;;  %s711_s15 = sshll.u32 %s1012_s3, 4  ;;  %s723_s17 = sshll.u32 %s1013_s16, 4  ;;  %s712_s15 = int_to_ptr.vmem [resolvable:$true] %s711_s15  ;;  %s724_s17 = int_to_ptr.vmem [resolvable:$true] %s723_s17 }
 0x12b   :  { %862 = vtanh.f32 %v537_v47  ;;  %v464_v54 = vadd.f32 %v463_v51, %v183_v19  ;;  %v547_v55 = vadd.f32 %v546_v52, %v191_v35  ;;  %s954_s18 = scalar_lea.vmem %s712_s15, 384  ;;  %p959_p7 = scmp.lt.s32.totalorder %s712_s15, %s712_s15 }
 0x12c   :  { %864 = vtanh.f32 %v541_v0  ;;  %v548_v56 = vpop.f32.mrf.mxu1  ;;  %v658_v60 = vmax.f32 %v454_v53, 0.0  ;;  %v465_v3 = vpop.f32.mrf.mxu0  ;;  %v659_v5 = vmax.f32 %v460_v62, 0.0  ;;  %p955_p6 = scmp.ne.s32.totalorder %s712_s15, %s954_s18  ;;  %p960_p8 = scmp.lt.s32.totalorder %s954_s18, %s954_s18 }
 0x12d   :  { %866 = vtanh.f32 %v543_v50  ;;  %v549_v58 = vadd.f32 %v548_v56, %v195_v37  ;;  %v466_v10 = vadd.f32 %v465_v3, %v187_v41 }
 0x12e   :  { %868 = vtanh.f32 %v464_v54  ;;  %v853_v59 = vpop.eup %852  ;;  %p961_p9 = por %p960_p8, %p959_p7 }
 0x12f   :  { %v661_v43 = vsub.f32 %v851_v57, %v853_v59  ;;  %870 = vtanh.f32 %v547_v55  ;;  %v855_v63 = vpop.eup %854  ;;  %v660_v18 = vmax.f32 %v466_v10, 0.0 }
 0x130   :  { %872 = vtanh.f32 %v549_v58  ;;  %p962_p10 = pnand %p961_p9, %p955_p6 }
 0x131   :  { %v664_v61 = vmul.f32 %v661_v43, %v658_v60 }
 0x133   :  { %v667_v1 = vadd.f32 %v853_v59, %v664_v61 }
 0x135   :  { %v857_v2 = vpop.eup %856  ;;  %670 = vst [vmem:[#allocation9] sm:$0xff] %v667_v1 }
 0x136   :  { %v859_v4 = vpop.eup %858  ;;  %v662_v6 = vsub.f32 %v855_v63, %v857_v2 }
 0x137   :  { %v861_v7 = vpop.eup %860 }
 0x138   :  { %v863_v8 = vpop.eup %862  ;;  %v665_v9 = vmul.f32 %v662_v6, %v659_v5 }
 0x139   :  { %v865_v11 = vpop.eup %864  ;;  %v682_v22 = vsub.f32 %v861_v7, %v863_v8 }
 0x13a   :  { %v867_v13 = vpop.eup %866  ;;  %v668_v14 = vadd.f32 %v857_v2, %v665_v9  ;;  %v617_v16 = vpop.f32.mrf.mxu0 }
 0x13b   :  { %v869_v15 = vpop.eup %868  ;;  %v622_v17 = vpop.f32.mrf.mxu1  ;;  %v618_v20 = vadd.f32 %v743_v12, %v617_v16  ;;  %v683_v29 = vsub.f32 %v865_v11, %v867_v13 }
 0x13c   :  { %671 = vst [vmem:[#allocation9 + $0x8] sm:$0xff] %v668_v14  ;;  %v663_v19 = vsub.f32 %v859_v4, %v869_v15  ;;  %v623_v21 = vadd.f32 %v743_v12, %v622_v17  ;;  %v797_v24 = vpop.f32.mrf.mxu0  ;;  %v871_v25 = vpop.eup %870 }
 0x13d   :  { %v800_v23 = vpop.f32.mrf.mxu1  ;;  %v679_v27 = vmax.f32 %v618_v20, 0.0  ;;  %v873_v30 = vpop.eup %872 }
 0x13e   :  { %v666_v26 = vmul.f32 %v663_v19, %v660_v18  ;;  %v680_v28 = vmax.f32 %v623_v21, 0.0  ;;  %v684_v40 = vsub.f32 %v871_v25, %v873_v30 }
 0x13f   :  { %v627_v31 = vpop.f32.mrf.mxu1  ;;  %v685_v33 = vmul.f32 %v682_v22, %v679_v27 }
 0x140   :  { %v669_v32 = vadd.f32 %v869_v15, %v666_v26  ;;  %v686_v34 = vmul.f32 %v683_v29, %v680_v28  ;;  %v628_v35 = vadd.f32 %v743_v12, %v627_v31 }
 0x141   :  { %v803_v36 = vpop.f32.mrf.mxu1  ;;  %v688_v37 = vadd.f32 %v863_v8, %v685_v33 }
 0x142   :  { %672 = vst [vmem:[#allocation9 + $0x10] sm:$0xff] %v669_v32  ;;  %v689_v38 = vadd.f32 %v867_v13, %v686_v34  ;;  %v681_v39 = vmax.f32 %v628_v35, 0.0 }
 0x143   :  { %965 = shalt.err (!%p962_p10)
}
 0x144   :  { %717 = dma.vmem_to_hbm [thread:$0]  %s712_s15, 384, %s1171_s4, [#allocation10], %s1006_s28, %s1006_s28, %s1007_s29   ;;  %691 = vst [vmem:[#allocation11] sm:$0xff] %v688_v37  ;;  %692 = vst [vmem:[#allocation11 + $0x8] sm:$0xff] %v689_v38  ;;  %v687_v42 = vmul.f32 %v684_v40, %v681_v39 }
 0x145   :  { %s974_s21 = scalar_lea.vmem %s724_s17, 384  ;;  %p979_p12 = scmp.lt.s32.totalorder %s724_s17, %s724_s17 }
 0x146   :  { %v690_v44 = vadd.f32 %v873_v30, %v687_v42  ;;  %p975_p11 = scmp.ne.s32.totalorder %s724_s17, %s974_s21  ;;  %p980_p13 = scmp.lt.s32.totalorder %s974_s21, %s974_s21 }
 0x148   :  { %693 = vst [vmem:[#allocation11 + $0x10] sm:$0xff] %v690_v44  ;;  %p981_p0 = por %p980_p13, %p979_p12 }
 0x14a   :  { %p982_p1 = pnand %p981_p0, %p975_p11 }
 0x14c   :  { %985 = shalt.err (!%p982_p1)
}
 0x14d   :  { %729 = dma.vmem_to_hbm [thread:$0]  %s724_s17, 384, %s1172_s5, [#allocation10], %s1006_s28, %s1006_s28, %s1007_s29  }
 0x14e   :  { %998 = dma.done.wait [#allocation4], 384  }
 0x14f   :  { %999 = vsyncadd [#allocation4], 4294966912 }
 0x150   :  { %1000 = dma.done.wait [#allocation10], 768  }
 0x151   :  { %1001 = vsyncadd [#allocation10], 4294966528 }
 0x152   :  { %739 = vsyncpa [#allocation3], 1 }
 0x153   :  { %740 = vsyncpa [#allocation6], 1 }
 0x154   :  { %741 = vsyncpa [#allocation4], 1 }
 0x155   :  { %742 = vsyncpa [#allocation10], 1 }

// kernel: _tri_gating_impl.1
= control target key start
LH: loop header
LB: loop body
LE: loop exit
PB: predicated region body
PF: predicated region fallthrough
CT: control target
= control target key end

     0   :  { %11 = vsyncpa [#allocation3], 0  ;;  %s1167_s0 = inlined_call_operand.hbm [shape: f32[24,88], index: 0, kind: input, shape index: {}]   ;;  %s1168_s1 = inlined_call_operand.hbm [shape: f32[88,1152], index: 1, kind: input, shape index: {}]   ;;  %s1169_s2 = inlined_call_operand.hbm [shape: f32[1,1152], index: 2, kind: input, shape index: {}]   ;;  %s1170_s3 = inlined_call_operand.hbm [shape: f32[24,128], index: 3, kind: output, shape index: {0}]   ;;  %s1171_s4 = inlined_call_operand.hbm [shape: f32[24,128], index: 4, kind: output, shape index: {1}]   ;;  %s1172_s5 = inlined_call_operand.hbm [shape: f32[24,128], index: 5, kind: output, shape index: {2}]  }
   0x1   :  { %12 = vsyncpa [#allocation6], 0 }
   0x2   :  { %13 = vsyncpa [#allocation4], 0 }
   0x3   :  { %14 = vsyncpa [#allocation10], 0  ;;  %s1002_s18 = smov [#allocation5]  }
   0x4   :  { %s32_s19 = sshll.u32 %s1002_s18, 4  ;;  %s33_s19 = int_to_ptr.vmem [resolvable:$true] %s32_s19 }
   0x5   :  { %s882_s20 = scalar_lea.vmem %s33_s19, 12672  ;;  %p887_p1 = scmp.lt.s32.totalorder %s33_s19, %s33_s19 }
   0x6   :  { %p883_p0 = scmp.ne.s32.totalorder %s33_s19, %s882_s20  ;;  %p888_p2 = scmp.lt.s32.totalorder %s882_s20, %s882_s20 }
   0x8   :  { %p889_p3 = por %p888_p2, %p887_p1 }
   0xa   :  { %p890_p4 = pnand %p889_p3, %p883_p0 }
   0xc   :  { %893 = shalt.err (!%p890_p4)
}
   0xd   :  { %s1003_s21 = smov 1152   ;;  %s1004_s22 = smov 72  }
   0xe   :  { %38 = dma.hbm_to_vmem [thread:$0]  %s1168_s1, 12672, %s33_s19, [#allocation6], %s1003_s21, %s1003_s21, %s1004_s22  }
   0xf   :  { %s1005_s25 = smov [#allocation2]  }
  0x10   :  { %s20_s26 = sshll.u32 %s1005_s25, 4  ;;  %s21_s26 = int_to_ptr.vmem [resolvable:$true] %s20_s26 }
  0x11   :  { %s902_s27 = scalar_lea.vmem %s21_s26, 384  ;;  %p907_p6 = scmp.lt.s32.totalorder %s21_s26, %s21_s26 }
  0x12   :  { %p903_p5 = scmp.ne.s32.totalorder %s21_s26, %s902_s27  ;;  %p908_p7 = scmp.lt.s32.totalorder %s902_s27, %s902_s27 }
  0x14   :  { %p909_p8 = por %p908_p7, %p907_p6 }
  0x16   :  { %p910_p9 = pnand %p909_p8, %p903_p5 }
  0x18   :  { %913 = shalt.err (!%p910_p9)
}
  0x19   :  { %s1006_s28 = smov 128   ;;  %s1007_s29 = smov 8  }
  0x1a   :  { %26 = dma.hbm_to_vmem [thread:$0]  %s1167_s0, 384, %s21_s26, [#allocation3], %s1006_s28, %s1006_s28, %s1007_s29  }
  0x1b   :  { %s1008_s1 = smov [#allocation7]  }
  0x1c   :  { %s45_s7 = sshll.u32 %s1008_s1, 4  ;;  %s46_s7 = int_to_ptr.vmem [resolvable:$true] %s45_s7 }
  0x1d   :  { %s922_s8 = scalar_lea.vmem %s46_s7, 144  ;;  %s926_s9 = scalar_lea.vmem %s46_s7, 160 }
  0x1e   :  { %p923_p10 = scmp.ne.s32.totalorder %s46_s7, %s922_s8  ;;  %p927_p11 = scmp.lt.s32.totalorder %s46_s7, %s46_s7 }
  0x1f   :  { %p928_p12 = scmp.lt.s32.totalorder %s926_s9, %s922_s8 }
  0x21   :  { %p929_p13 = por %p928_p12, %p927_p11 }
  0x23   :  { %p930_p0 = pnand %p929_p13, %p923_p10 }
  0x25   :  { %933 = shalt.err (!%p930_p0)
}
  0x26   :  { %48 = dma.hbm_to_vmem [thread:$0]  %s1169_s2, 144, %s46_s7, [#allocation6]  }
  0x27   :  { %994 = dma.done.wait [#allocation3], 384  }
  0x28   :  { %995 = vsyncadd [#allocation3], 4294966912 }
  0x29   :  { %996 = dma.done.wait [#allocation6], 12816  }
  0x2a   :  { %997 = vsyncadd [#allocation6], 4294954480  ;;  %v1009_v0 = vmov 0.0   ;;  %v152_v1 = vld [vmem:[#allocation5 + $0x2d8] sm:$0xff]  ;;  %v154_v2 = vld [vmem:[#allocation5 + $0x2e8] sm:$0xff]  ;;  %vm209_vm0 = vcmask 719872  }
  0x2b   :  { %283 = vmatprep.mubr.f32.mxu0 %v1009_v0  ;;  %366 = vmatprep.mubr.f32.mxu1 %v1009_v0  ;;  %v151_v3 = vld [vmem:[#allocation5 + $0x2d0] sm:$0xff]  ;;  %v153_v4 = vld [vmem:[#allocation5 + $0x2e0] sm:$0xff]  ;;  %v142_v7 = vld [vmem:[#allocation5 + $0x288] sm:$0xff]  ;;  %vm1010_vm1 = vmmov 0   ;;  %s1011_s0 = smov [#allocation8]  }
  0x2c   :  { %229 = vmatprep.subr.mxu0 %v152_v1  ;;  %312 = vmatprep.subr.mxu1 %v154_v2  ;;  %v143_v5 = vld [vmem:[#allocation5 + $0x290] sm:$0xff]  ;;  %v145_v6 = vld [vmem:[#allocation5 + $0x2a0] sm:$0xff]  ;;  %v144_v8 = vld [vmem:[#allocation5 + $0x298] sm:$0xff]  ;;  %s699_s2 = sshll.u32 %s1011_s0, 4  ;;  %s700_s2 = int_to_ptr.vmem [resolvable:$true] %s699_s2 }
  0x2d   :  { %230 = vmatpush1.msra.mxu0 %v151_v3  ;;  %313 = vmatpush1.msra.mxu1 %v153_v4  ;;  %v134_v9 = vld [vmem:[#allocation5 + $0x248] sm:$0xff]  ;;  %v136_v10 = vld [vmem:[#allocation5 + $0x258] sm:$0xff]  ;;  %v133_v11 = vld [vmem:[#allocation5 + $0x240] sm:$0xff]  ;;  %s934_s12 = scalar_lea.vmem %s700_s2, 384  ;;  %p939_p2 = scmp.lt.s32.totalorder %s700_s2, %s700_s2 }
  0x2e   :  { %231 = vmatprep.subr.mxu0 %v143_v5  ;;  %314 = vmatprep.subr.mxu1 %v145_v6  ;;  %v135_v12 = vld [vmem:[#allocation5 + $0x250] sm:$0xff]  ;;  %v125_v13 = vld [vmem:[#allocation5 + $0x200] sm:$0xff]  ;;  %v124_v15 = vld [vmem:[#allocation5 + $0x1f8] sm:$0xff]  ;;  %p935_p1 = scmp.ne.s32.totalorder %s700_s2, %s934_s12  ;;  %p940_p3 = scmp.lt.s32.totalorder %s934_s12, %s934_s12 }
  0x2f   :  { %232 = vmatpush1.msra.mxu0 %v142_v7  ;;  %315 = vmatpush1.msra.mxu1 %v144_v8  ;;  %v127_v14 = vld [vmem:[#allocation5 + $0x210] sm:$0xff]  ;;  %v126_v16 = vld [vmem:[#allocation5 + $0x208] sm:$0xff]  ;;  %v116_v17 = vld [vmem:[#allocation5 + $0x1b8] sm:$0xff] }
  0x30   :  { %233 = vmatprep.subr.mxu0 %v134_v9  ;;  %316 = vmatprep.subr.mxu1 %v136_v10  ;;  %v118_v18 = vld [vmem:[#allocation5 + $0x1c8] sm:$0xff]  ;;  %v115_v19 = vld [vmem:[#allocation5 + $0x1b0] sm:$0xff]  ;;  %v117_v20 = vld [vmem:[#allocation5 + $0x1c0] sm:$0xff]  ;;  %p941_p4 = por %p940_p3, %p939_p2 }
  0x31   :  { %234 = vmatpush1.msra.mxu0 %v133_v11  ;;  %317 = vmatpush1.msra.mxu1 %v135_v12  ;;  %v107_v21 = vld [vmem:[#allocation5 + $0x170] sm:$0xff]  ;;  %v109_v22 = vld [vmem:[#allocation5 + $0x180] sm:$0xff]  ;;  %v106_v23 = vld [vmem:[#allocation5 + $0x168] sm:$0xff] }
  0x32   :  { %235 = vmatprep.subr.mxu0 %v125_v13  ;;  %318 = vmatprep.subr.mxu1 %v127_v14  ;;  %v108_v24 = vld [vmem:[#allocation5 + $0x178] sm:$0xff]  ;;  %v98_v25 = vld [vmem:[#allocation5 + $0x128] sm:$0xff]  ;;  %v97_v27 = vld [vmem:[#allocation5 + $0x120] sm:$0xff]  ;;  %p942_p5 = pnand %p941_p4, %p935_p1 }
  0x33   :  { %236 = vmatpush1.msra.mxu0 %v124_v15  ;;  %319 = vmatpush1.msra.mxu1 %v126_v16  ;;  %v100_v26 = vld [vmem:[#allocation5 + $0x138] sm:$0xff]  ;;  %v99_v28 = vld [vmem:[#allocation5 + $0x130] sm:$0xff]  ;;  %v89_v29 = vld [vmem:[#allocation5 + $0xe0] sm:$0xff] }
  0x34   :  { %237 = vmatprep.subr.mxu0 %v116_v17  ;;  %320 = vmatprep.subr.mxu1 %v118_v18  ;;  %v91_v30 = vld [vmem:[#allocation5 + $0xf0] sm:$0xff]  ;;  %v88_v31 = vld [vmem:[#allocation5 + $0xd8] sm:$0xff]  ;;  %v90_v32 = vld [vmem:[#allocation5 + $0xe8] sm:$0xff] }
  0x35   :  { %238 = vmatpush1.msra.mxu0 %v115_v19  ;;  %321 = vmatpush1.msra.mxu1 %v117_v20  ;;  %v80_v33 = vld [vmem:[#allocation5 + $0x98] sm:$0xff]  ;;  %v82_v34 = vld [vmem:[#allocation5 + $0xa8] sm:$0xff]  ;;  %v79_v35 = vld [vmem:[#allocation5 + $0x90] sm:$0xff] }
  0x36   :  { %239 = vmatprep.subr.mxu0 %v107_v21  ;;  %322 = vmatprep.subr.mxu1 %v109_v22  ;;  %v81_v36 = vld [vmem:[#allocation5 + $0xa0] sm:$0xff]  ;;  %v71_v37 = vld [vmem:[#allocation5 + $0x50] sm:$0xff]  ;;  %v70_v39 = vld [vmem:[#allocation5 + $0x48] sm:$0xff] }
  0x37   :  { %240 = vmatpush1.msra.mxu0 %v106_v23  ;;  %323 = vmatpush1.msra.mxu1 %v108_v24  ;;  %v73_v38 = vld [vmem:[#allocation5 + $0x60] sm:$0xff]  ;;  %v72_v40 = vld [vmem:[#allocation5 + $0x58] sm:$0xff]  ;;  %v62_v41 = vld [vmem:[#allocation5 + $0x8] sm:$0xff] }
  0x38   :  { %241 = vmatprep.subr.mxu0 %v98_v25  ;;  %324 = vmatprep.subr.mxu1 %v100_v26  ;;  %v64_v42 = vld [vmem:[#allocation5 + $0x18] sm:$0xff]  ;;  %v61_v43 = vld [vmem:[#allocation5] sm:$0xff]  ;;  %v63_v44 = vld [vmem:[#allocation5 + $0x10] sm:$0xff] }
  0x39   :  { %242 = vmatpush1.msra.mxu0 %v97_v27  ;;  %325 = vmatpush1.msra.mxu1 %v99_v28  ;;  %v1058_v45 = vld [vmem:[#allocation2] sm:$0xff]  ;;  %v156_v46 = vld [vmem:[#allocation5 + $0x2f8] sm:$0xff]  ;;  %v155_v48 = vld [vmem:[#allocation5 + $0x2f0] sm:$0xff] }
  0x3a   :  { %243 = vmatprep.subr.mxu0 %v89_v29  ;;  %326 = vmatprep.subr.mxu1 %v91_v30  ;;  %v158_v47 = vld [vmem:[#allocation5 + $0x308] sm:$0xff]  ;;  %v157_v49 = vld [vmem:[#allocation5 + $0x300] sm:$0xff]  ;;  %v147_v50 = vld [vmem:[#allocation5 + $0x2b0] sm:$0xff] }
  0x3b   :  { %244 = vmatpush1.msra.mxu0 %v88_v31  ;;  %327 = vmatpush1.msra.mxu1 %v90_v32  ;;  %v149_v51 = vld [vmem:[#allocation5 + $0x2c0] sm:$0xff]  ;;  %v146_v52 = vld [vmem:[#allocation5 + $0x2a8] sm:$0xff]  ;;  %v148_v53 = vld [vmem:[#allocation5 + $0x2b8] sm:$0xff] }
  0x3c   :  { %245 = vmatprep.subr.mxu0 %v80_v33  ;;  %328 = vmatprep.subr.mxu1 %v82_v34  ;;  %v1064_v54 = vld [vmem:[#allocation2 + $0x8] sm:$0xff]  ;;  %v138_v55 = vld [vmem:[#allocation5 + $0x268] sm:$0xff]  ;;  %v140_v56 = vld [vmem:[#allocation5 + $0x278] sm:$0xff] }
  0x3d   :  { %246 = vmatpush1.msra.mxu0 %v79_v35  ;;  %329 = vmatpush1.msra.mxu1 %v81_v36  ;;  %v137_v57 = vld [vmem:[#allocation5 + $0x260] sm:$0xff]  ;;  %v139_v58 = vld [vmem:[#allocation5 + $0x270] sm:$0xff]  ;;  %v128_v61 = vld [vmem:[#allocation5 + $0x218] sm:$0xff] }
  0x3e   :  { %247 = vmatprep.subr.mxu0 %v71_v37  ;;  %330 = vmatprep.subr.mxu1 %v73_v38  ;;  %v129_v59 = vld [vmem:[#allocation5 + $0x220] sm:$0xff]  ;;  %v131_v60 = vld [vmem:[#allocation5 + $0x230] sm:$0xff]  ;;  %v130_v62 = vld [vmem:[#allocation5 + $0x228] sm:$0xff] }
  0x3f   :  { %248 = vmatpush1.msra.mxu0 %v70_v39  ;;  %331 = vmatpush1.msra.mxu1 %v72_v40  ;;  %v1069_v63 = vld [vmem:[#allocation2 + $0x10] sm:$0xff]  ;;  %v122_v2 = vld [vmem:[#allocation5 + $0x1e8] sm:$0xff]  ;;  %v119_v3 = vld [vmem:[#allocation5 + $0x1d0] sm:$0xff]  ;;  %v164_v40 = vlaneseq }
  0x40   :  { %249 = vmatprep.subr.mxu0 %v62_v41  ;;  %332 = vmatprep.subr.mxu1 %v64_v42  ;;  %v120_v1 = vld [vmem:[#allocation5 + $0x1d8] sm:$0xff]  ;;  %v121_v4 = vld [vmem:[#allocation5 + $0x1e0] sm:$0xff]  ;;  %v111_v5 = vld [vmem:[#allocation5 + $0x190] sm:$0xff] }
  0x41   :  { %250 = vmatpush1.msra.mxu0 %v61_v43  ;;  %333 = vmatpush1.msra.mxu1 %v63_v44  ;;  %v113_v6 = vld [vmem:[#allocation5 + $0x1a0] sm:$0xff]  ;;  %v110_v7 = vld [vmem:[#allocation5 + $0x188] sm:$0xff]  ;;  %v112_v8 = vld [vmem:[#allocation5 + $0x198] sm:$0xff]  ;;  %v1129_v41 = vshrl.u32 %v164_v40, 7 }
  0x42   :  { %744 = vmatmul.mubr.msk.f32.vlgmr.msra.gmra.mxu0 %vm209_vm0, %v1058_v45  ;;  %747 = vmatmul.mubr.msk.f32.vlgmr.msra.gmra.mxu1 %vm209_vm0, %v1058_v45  ;;  %v102_v9 = vld [vmem:[#allocation5 + $0x148] sm:$0xff]  ;;  %v104_v10 = vld [vmem:[#allocation5 + $0x158] sm:$0xff]  ;;  %v101_v11 = vld [vmem:[#allocation5 + $0x140] sm:$0xff] }
  0x43   :  { %395 = vmatprep.subr.mxu0 %v156_v46  ;;  %478 = vmatprep.subr.mxu1 %v158_v47  ;;  %v103_v12 = vld [vmem:[#allocation5 + $0x150] sm:$0xff]  ;;  %v93_v13 = vld [vmem:[#allocation5 + $0x100] sm:$0xff]  ;;  %v92_v15 = vld [vmem:[#allocation5 + $0xf8] sm:$0xff]  ;;  %v166_v42 = vsub.s32 0, %v1129_v41  ;;  %v170_v44 = vsub.s32 1, %v1129_v41 }
  0x44   :  { %396 = vmatpush1.msra.mxu0 %v155_v48  ;;  %479 = vmatpush1.msra.mxu1 %v157_v49  ;;  %v95_v14 = vld [vmem:[#allocation5 + $0x110] sm:$0xff]  ;;  %v94_v16 = vld [vmem:[#allocation5 + $0x108] sm:$0xff]  ;;  %v84_v17 = vld [vmem:[#allocation5 + $0xb8] sm:$0xff] }
  0x45   :  { %397 = vmatprep.subr.mxu0 %v147_v50  ;;  %480 = vmatprep.subr.mxu1 %v149_v51  ;;  %v86_v18 = vld [vmem:[#allocation5 + $0xc8] sm:$0xff]  ;;  %v83_v19 = vld [vmem:[#allocation5 + $0xb0] sm:$0xff]  ;;  %v85_v20 = vld [vmem:[#allocation5 + $0xc0] sm:$0xff] }
  0x46   :  { %289 = vmatprep.mubr.f32.mxu0 %v1009_v0  ;;  %398 = vmatpush1.msra.mxu0 %v146_v52  ;;  %v75_v21 = vld [vmem:[#allocation5 + $0x70] sm:$0xff]  ;;  %v77_v22 = vld [vmem:[#allocation5 + $0x80] sm:$0xff]  ;;  %v74_v23 = vld [vmem:[#allocation5 + $0x68] sm:$0xff]  ;;  %v174_v52 = vsub.s32 2, %v1129_v41 }
  0x47   :  { %481 = vmatpush1.msra.mxu1 %v148_v53  ;;  %745 = vmatmul.mubr.msk.f32.gmra.mxu0 %vm209_vm0, %v1064_v54  ;;  %v76_v24 = vld [vmem:[#allocation5 + $0x78] sm:$0xff]  ;;  %v66_v25 = vld [vmem:[#allocation5 + $0x28] sm:$0xff]  ;;  %v65_v27 = vld [vmem:[#allocation5 + $0x20] sm:$0xff] }
  0x48   :  { %399 = vmatprep.subr.mxu0 %v138_v55  ;;  %482 = vmatprep.subr.mxu1 %v140_v56  ;;  %v68_v26 = vld [vmem:[#allocation5 + $0x38] sm:$0xff]  ;;  %v67_v28 = vld [vmem:[#allocation5 + $0x30] sm:$0xff]  ;;  %v150_v30 = vld [vmem:[#allocation5 + $0x2c8] sm:$0xff] }
  0x49   :  { %400 = vmatpush1.msra.mxu0 %v137_v57  ;;  %483 = vmatpush1.msra.mxu1 %v139_v58  ;;  %v159_v29 = vld [vmem:[#allocation5 + $0x310] sm:$0xff]  ;;  %v141_v31 = vld [vmem:[#allocation5 + $0x280] sm:$0xff]  ;;  %v132_v32 = vld [vmem:[#allocation5 + $0x238] sm:$0xff] }
  0x4a   :  { %401 = vmatprep.subr.mxu0 %v129_v59  ;;  %484 = vmatprep.subr.mxu1 %v131_v60  ;;  %v123_v33 = vld [vmem:[#allocation5 + $0x1f0] sm:$0xff]  ;;  %v114_v34 = vld [vmem:[#allocation5 + $0x1a8] sm:$0xff]  ;;  %v105_v35 = vld [vmem:[#allocation5 + $0x160] sm:$0xff] }
  0x4b   :  { %295 = vmatprep.mubr.f32.mxu0 %v1009_v0  ;;  %402 = vmatpush1.msra.mxu0 %v128_v61  ;;  %v96_v36 = vld [vmem:[#allocation5 + $0x118] sm:$0xff]  ;;  %v87_v37 = vld [vmem:[#allocation5 + $0xd0] sm:$0xff]  ;;  %v78_v38 = vld [vmem:[#allocation5 + $0x88] sm:$0xff] }
  0x4c   :  { %485 = vmatpush1.msra.mxu1 %v130_v62  ;;  %746 = vmatmul.mubr.msk.f32.gmra.mxu0 %vm209_vm0, %v1069_v63  ;;  %v69_v39 = vld [vmem:[#allocation5 + $0x40] sm:$0xff]  ;;  %v1132_v43 = vld [vmem:[#allocation7] sm:$0xff] }
  0x4d   :  { %403 = vmatprep.subr.mxu0 %v120_v1  ;;  %486 = vmatprep.subr.mxu1 %v122_v2  ;;  %v167_v46 = vrot.slane %v1132_v43, %v166_v42  ;;  %v175_v57 = vrot.slane %v1132_v43, %v174_v52 }
  0x4e   :  { %404 = vmatpush1.msra.mxu0 %v119_v3  ;;  %487 = vmatpush1.msra.mxu1 %v121_v4  ;;  %v178_v3 = vsub.s32 3, %v1129_v41 }
  0x4f   :  { %405 = vmatprep.subr.mxu0 %v111_v5  ;;  %488 = vmatprep.subr.mxu1 %v113_v6 }
  0x50   :  { %406 = vmatpush1.msra.mxu0 %v110_v7  ;;  %489 = vmatpush1.msra.mxu1 %v112_v8 }
  0x51   :  { %372 = vmatprep.mubr.f32.mxu1 %v1009_v0  ;;  %407 = vmatprep.subr.mxu0 %v102_v9 }
  0x52   :  { %490 = vmatprep.subr.mxu1 %v104_v10  ;;  %748 = vmatmul.mubr.msk.f32.gmra.mxu1 %vm209_vm0, %v1064_v54  ;;  %v182_v10 = vsub.s32 4, %v1129_v41 }
  0x53   :  { %408 = vmatpush1.msra.mxu0 %v101_v11  ;;  %491 = vmatpush1.msra.mxu1 %v103_v12  ;;  %v179_v12 = vrot.slane %v1132_v43, %v178_v3 }
  0x54   :  { %409 = vmatprep.subr.mxu0 %v93_v13  ;;  %492 = vmatprep.subr.mxu1 %v95_v14 }
  0x55   :  { %410 = vmatpush1.msra.mxu0 %v92_v15  ;;  %493 = vmatpush1.msra.mxu1 %v94_v16 }
  0x56   :  { %378 = vmatprep.mubr.f32.mxu1 %v1009_v0  ;;  %411 = vmatprep.subr.mxu0 %v84_v17 }
  0x57   :  { %494 = vmatprep.subr.mxu1 %v86_v18  ;;  %749 = vmatmul.mubr.msk.f32.gmra.mxu1 %vm209_vm0, %v1069_v63 }
  0x58   :  { %412 = vmatpush1.msra.mxu0 %v83_v19  ;;  %495 = vmatpush1.msra.mxu1 %v85_v20  ;;  %v183_v19 = vrot.slane %v1132_v43, %v182_v10 }
  0x59   :  { %413 = vmatprep.subr.mxu0 %v75_v21  ;;  %496 = vmatprep.subr.mxu1 %v77_v22 }
  0x5a   :  { %414 = vmatpush1.msra.mxu0 %v74_v23  ;;  %497 = vmatpush1.msra.mxu1 %v76_v24  ;;  %v190_v23 = vsub.s32 6, %v1129_v41 }
  0x5b   :  { %415 = vmatprep.subr.mxu0 %v66_v25  ;;  %498 = vmatprep.subr.mxu1 %v68_v26 }
  0x5c   :  { %416 = vmatpush1.msra.mxu0 %v65_v27  ;;  %449 = vmatprep.mubr.f32.mxu0 %v1009_v0 }
  0x5d   :  { %499 = vmatpush1.msra.mxu1 %v67_v28  ;;  %532 = vmatprep.mubr.f32.mxu1 %v1009_v0  ;;  %v194_v28 = vsub.s32 7, %v1129_v41 }
  0x5e   :  { %750 = vmatmul.mubr.msk.f32.vlgmr.msra.gmra.mxu0 %vm209_vm0, %v1058_v45  ;;  %753 = vmatmul.mubr.msk.f32.vlgmr.msra.gmra.mxu1 %vm209_vm0, %v1058_v45 }
  0x5f   :  { %773 = vmatprep.subr.mxu0 %v1009_v0  ;;  %804 = vmatprep.subr.mxu1 %v1009_v0 }
  0x60   :  { %774 = vmatpush3.msra.mxu0 %v159_v29  ;;  %815 = vmatpush3.msra.mxu1 %v159_v29 }
  0x61   :  { %775 = vmatprep.subr.mxu0 %v1009_v0  ;;  %805 = vmatprep.subr.mxu1 %v1009_v0 }
  0x62   :  { %455 = vmatprep.mubr.f32.mxu0 %v1009_v0  ;;  %538 = vmatprep.mubr.f32.mxu1 %v1009_v0 }
  0x63   :  { %776 = vmatpush3.msra.mxu0 %v150_v30  ;;  %816 = vmatpush3.msra.mxu1 %v150_v30 }
  0x64   :  { %751 = vmatmul.mubr.msk.f32.gmra.mxu0 %vm209_vm0, %v1064_v54  ;;  %754 = vmatmul.mubr.msk.f32.gmra.mxu1 %vm209_vm0, %v1064_v54 }
  0x65   :  { %777 = vmatprep.subr.mxu0 %v1009_v0  ;;  %806 = vmatprep.subr.mxu1 %v1009_v0 }
  0x66   :  { %778 = vmatpush3.msra.mxu0 %v141_v31  ;;  %817 = vmatpush3.msra.mxu1 %v141_v31 }
  0x67   :  { %779 = vmatprep.subr.mxu0 %v1009_v0  ;;  %807 = vmatprep.subr.mxu1 %v1009_v0 }
  0x68   :  { %461 = vmatprep.mubr.f32.mxu0 %v1009_v0  ;;  %544 = vmatprep.mubr.f32.mxu1 %v1009_v0 }
  0x69   :  { %780 = vmatpush3.msra.mxu0 %v132_v32  ;;  %818 = vmatpush3.msra.mxu1 %v132_v32 }
  0x6a   :  { %752 = vmatmul.mubr.msk.f32.gmra.mxu0 %vm209_vm0, %v1069_v63  ;;  %755 = vmatmul.mubr.msk.f32.gmra.mxu1 %vm209_vm0, %v1069_v63 }
  0x6b   :  { %781 = vmatprep.subr.mxu0 %v1009_v0  ;;  %808 = vmatprep.subr.mxu1 %v1009_v0 }
  0x6c   :  { %782 = vmatpush3.msra.mxu0 %v123_v33  ;;  %819 = vmatpush3.msra.mxu1 %v123_v33 }
  0x6d   :  { %783 = vmatprep.subr.mxu0 %v1009_v0  ;;  %809 = vmatprep.subr.mxu1 %v1009_v0 }
  0x6e   :  { %784 = vmatpush3.msra.mxu0 %v114_v34  ;;  %820 = vmatpush3.msra.mxu1 %v114_v34 }
  0x6f   :  { %785 = vmatprep.subr.mxu0 %v1009_v0  ;;  %810 = vmatprep.subr.mxu1 %v1009_v0 }
  0x70   :  { %786 = vmatpush3.msra.mxu0 %v105_v35  ;;  %821 = vmatpush3.msra.mxu1 %v105_v35  ;;  %v191_v35 = vrot.slane %v1132_v43, %v190_v23 }
  0x71   :  { %787 = vmatprep.subr.mxu0 %v1009_v0  ;;  %811 = vmatprep.subr.mxu1 %v1009_v0 }
  0x72   :  { %788 = vmatpush3.msra.mxu0 %v96_v36  ;;  %822 = vmatpush3.msra.mxu1 %v96_v36 }
  0x73   :  { %789 = vmatprep.subr.mxu0 %v1009_v0  ;;  %812 = vmatprep.subr.mxu1 %v1009_v0 }
  0x74   :  { %790 = vmatpush3.msra.mxu0 %v87_v37  ;;  %823 = vmatpush3.msra.mxu1 %v87_v37  ;;  %v195_v37 = vrot.slane %v1132_v43, %v194_v28 }
  0x75   :  { %791 = vmatprep.subr.mxu0 %v1009_v0  ;;  %813 = vmatprep.subr.mxu1 %v1009_v0 }
  0x76   :  { %792 = vmatpush3.msra.mxu0 %v78_v38  ;;  %824 = vmatpush3.msra.mxu1 %v78_v38 }
  0x77   :  { %793 = vmatprep.subr.mxu0 %v1009_v0  ;;  %814 = vmatprep.subr.mxu1 %v1009_v0 }
  0x78   :  { %794 = vmatpush3.msra.mxu0 %v69_v39  ;;  %825 = vmatpush3.msra.mxu1 %v69_v39  ;;  %v186_v39 = vsub.s32 5, %v1129_v41 }
  0x79   :  { %795 = vmatprep.mubr.msk.f32.mxu0 %vm1010_vm1, %v1009_v0  ;;  %798 = vmatprep.mubr.msk.f32.mxu1 %vm1010_vm1, %v1009_v0 }
  0x7a   :  { %796 = vmatmul.mubr.msk.f32.vlgmr.msra.gmra.mxu0 %vm209_vm0, %v1058_v45  ;;  %799 = vmatmul.mubr.msk.f32.vlgmr.msra.gmra.mxu1 %vm209_vm0, %v1064_v54  ;;  %v171_v45 = vrot.slane %v1132_v43, %v170_v44 }
  0x7b   :  { %801 = vmatprep.mubr.msk.f32.mxu1 %vm1010_vm1, %v1009_v0 }
  0x7e   :  { %802 = vmatmul.mubr.msk.f32.gmra.mxu1 %vm209_vm0, %v1069_v63 }
 0x102   :  { %v285_v47 = vpop.f32.mrf.mxu0  ;;  %v368_v55 = vpop.f32.mrf.mxu1 }
 0x103   :  { %v286_v48 = vadd.f32 %v285_v47, %v167_v46  ;;  %v369_v62 = vadd.f32 %v368_v55, %v175_v57 }
 0x104   :  { %v287_v49 = vpop.f32.mrf.mxu0  ;;  %v370_v61 = vpop.f32.mrf.mxu1 }
 0x105   :  { %838 = vtanh.f32 %v286_v48  ;;  %v288_v0 = vadd.f32 %v287_v49, %v171_v45  ;;  %v637_v5 = vmax.f32 %v369_v62, 0.0  ;;  %v371_v21 = vadd.f32 %v370_v61, %v179_v12 }
 0x107   :  { %840 = vtanh.f32 %v288_v0  ;;  %v291_v50 = vpop.f32.mrf.mxu0 }
 0x108   :  { %v292_v51 = vadd.f32 %v291_v50, %v167_v46 }
 0x109   :  { %v293_v53 = vpop.f32.mrf.mxu0 }
 0x10a   :  { %842 = vtanh.f32 %v292_v51  ;;  %v294_v54 = vadd.f32 %v293_v53, %v171_v45 }
 0x10c   :  { %844 = vtanh.f32 %v294_v54  ;;  %v297_v56 = vpop.f32.mrf.mxu0 }
 0x10d   :  { %v298_v58 = vadd.f32 %v297_v56, %v167_v46 }
 0x10e   :  { %v299_v59 = vpop.f32.mrf.mxu0 }
 0x10f   :  { %846 = vtanh.f32 %v298_v58  ;;  %v300_v60 = vadd.f32 %v299_v59, %v171_v45 }
 0x111   :  { %848 = vtanh.f32 %v300_v60 }
 0x112   :  { %v839_v63 = vpop.eup %838  ;;  %v374_v1 = vpop.f32.mrf.mxu1  ;;  %850 = vtanh.f32 %v371_v21 }
 0x113   :  { %v375_v7 = vadd.f32 %v374_v1, %v175_v57 }
 0x114   :  { %v841_v2 = vpop.eup %840  ;;  %v376_v4 = vpop.f32.mrf.mxu1 }
 0x115   :  { %v640_v6 = vsub.f32 %v839_v63, %v841_v2  ;;  %v638_v15 = vmax.f32 %v375_v7, 0.0  ;;  %v377_v36 = vadd.f32 %v376_v4, %v179_v12 }
 0x117   :  { %v843_v8 = vpop.eup %842  ;;  %v380_v9 = vpop.f32.mrf.mxu1  ;;  %v643_v11 = vmul.f32 %v640_v6, %v637_v5 }
 0x118   :  { %v381_v18 = vadd.f32 %v380_v9, %v175_v57 }
 0x119   :  { %v845_v13 = vpop.eup %844  ;;  %v646_v14 = vadd.f32 %v841_v2, %v643_v11  ;;  %v382_v17 = vpop.f32.mrf.mxu1 }
 0x11a   :  { %v641_v16 = vsub.f32 %v843_v8, %v845_v13  ;;  %v639_v29 = vmax.f32 %v381_v18, 0.0  ;;  %v383_v40 = vadd.f32 %v382_v17, %v179_v12 }
 0x11b   :  { %649 = vst [vmem:[#allocation8] sm:$0xff] %v646_v14 }
 0x11c   :  { %v847_v20 = vpop.eup %846  ;;  %v644_v22 = vmul.f32 %v641_v16, %v638_v15 }
 0x11e   :  { %v849_v24 = vpop.eup %848  ;;  %v647_v25 = vadd.f32 %v845_v13, %v644_v22  ;;  %v451_v26 = vpop.f32.mrf.mxu0 }
 0x11f   :  { %v534_v27 = vpop.f32.mrf.mxu1  ;;  %v642_v30 = vsub.f32 %v847_v20, %v849_v24  ;;  %v452_v31 = vadd.f32 %v451_v26, %v183_v19 }
 0x120   :  { %650 = vst [vmem:[#allocation8 + $0x8] sm:$0xff] %v647_v25  ;;  %v453_v32 = vpop.f32.mrf.mxu0  ;;  %v535_v46 = vadd.f32 %v534_v27, %v191_v35 }
 0x121   :  { %v536_v33 = vpop.f32.mrf.mxu1  ;;  %v645_v34 = vmul.f32 %v642_v30, %v639_v29  ;;  %852 = vtanh.f32 %v452_v31 }
 0x122   :  { %854 = vtanh.f32 %v377_v36  ;;  %v537_v47 = vadd.f32 %v536_v33, %v195_v37 }
 0x123   :  { %v648_v38 = vadd.f32 %v849_v24, %v645_v34 }
 0x124   :  { %v457_v42 = vpop.f32.mrf.mxu0  ;;  %v540_v44 = vpop.f32.mrf.mxu1 }
 0x125   :  { %651 = vst [vmem:[#allocation8 + $0x10] sm:$0xff] %v648_v38  ;;  %v458_v45 = vadd.f32 %v457_v42, %v183_v19 }
 0x126   :  { %v459_v48 = vpop.f32.mrf.mxu0  ;;  %v542_v49 = vpop.f32.mrf.mxu1 }
 0x127   :  { %945 = shalt.err (!%p942_p5)
}
 0x128   :  { %705 = dma.vmem_to_hbm [thread:$0]  %s700_s2, 384, %s1170_s3, [#allocation4], %s1006_s28, %s1006_s28, %s1007_s29   ;;  %v187_v41 = vrot.slane %v1132_v43, %v186_v39  ;;  %856 = vtanh.f32 %v458_v45  ;;  %v541_v0 = vadd.f32 %v540_v44, %v191_v35  ;;  %v543_v50 = vadd.f32 %v542_v49, %v195_v37  ;;  %v851_v57 = vpop.eup %850  ;;  %v743_v12 = vld [vmem:[#allocation7 + $0x8] ss:$0 sm:$0xff] }
 0x129   :  { %858 = vtanh.f32 %v383_v40  ;;  %s1012_s3 = smov [#allocation9]   ;;  %s1013_s16 = smov [#allocation11]  }
 0x12a   :  { %860 = vtanh.f32 %v535_v46  ;;  %v463_v51 = vpop.f32.mrf.mxu0  ;;  %v546_v52 = vpop.f32.mrf.mxu1  ;;  %v454_v53 = vadd.f32 %v453_v32, %v187_v41  ;;  %v460_v62 = vadd.f32 %v459_v48, %v187_v41  ;;  %s711_s15 = sshll.u32 %s1012_s3, 4  ;;  %s723_s17 = sshll.u32 %s1013_s16, 4  ;;  %s712_s15 = int_to_ptr.vmem [resolvable:$true] %s711_s15  ;;  %s724_s17 = int_to_ptr.vmem [resolvable:$true] %s723_s17 }
 0x12b   :  { %862 = vtanh.f32 %v537_v47  ;;  %v464_v54 = vadd.f32 %v463_v51, %v183_v19  ;;  %v547_v55 = vadd.f32 %v546_v52, %v191_v35  ;;  %s954_s18 = scalar_lea.vmem %s712_s15, 384  ;;  %p959_p7 = scmp.lt.s32.totalorder %s712_s15, %s712_s15 }
 0x12c   :  { %864 = vtanh.f32 %v541_v0  ;;  %v548_v56 = vpop.f32.mrf.mxu1  ;;  %v658_v60 = vmax.f32 %v454_v53, 0.0  ;;  %v465_v3 = vpop.f32.mrf.mxu0  ;;  %v659_v5 = vmax.f32 %v460_v62, 0.0  ;;  %p955_p6 = scmp.ne.s32.totalorder %s712_s15, %s954_s18  ;;  %p960_p8 = scmp.lt.s32.totalorder %s954_s18, %s954_s18 }
 0x12d   :  { %866 = vtanh.f32 %v543_v50  ;;  %v549_v58 = vadd.f32 %v548_v56, %v195_v37  ;;  %v466_v10 = vadd.f32 %v465_v3, %v187_v41 }
 0x12e   :  { %868 = vtanh.f32 %v464_v54  ;;  %v853_v59 = vpop.eup %852  ;;  %p961_p9 = por %p960_p8, %p959_p7 }
 0x12f   :  { %v661_v43 = vsub.f32 %v851_v57, %v853_v59  ;;  %870 = vtanh.f32 %v547_v55  ;;  %v855_v63 = vpop.eup %854  ;;  %v660_v18 = vmax.f32 %v466_v10, 0.0 }
 0x130   :  { %872 = vtanh.f32 %v549_v58  ;;  %p962_p10 = pnand %p961_p9, %p955_p6 }
 0x131   :  { %v664_v61 = vmul.f32 %v661_v43, %v658_v60 }
 0x133   :  { %v667_v1 = vadd.f32 %v853_v59, %v664_v61 }
 0x135   :  { %v857_v2 = vpop.eup %856  ;;  %670 = vst [vmem:[#allocation9] sm:$0xff] %v667_v1 }
 0x136   :  { %v859_v4 = vpop.eup %858  ;;  %v662_v6 = vsub.f32 %v855_v63, %v857_v2 }
 0x137   :  { %v861_v7 = vpop.eup %860 }
 0x138   :  { %v863_v8 = vpop.eup %862  ;;  %v665_v9 = vmul.f32 %v662_v6, %v659_v5 }
 0x139   :  { %v865_v11 = vpop.eup %864  ;;  %v682_v22 = vsub.f32 %v861_v7, %v863_v8 }
 0x13a   :  { %v867_v13 = vpop.eup %866  ;;  %v668_v14 = vadd.f32 %v857_v2, %v665_v9  ;;  %v617_v16 = vpop.f32.mrf.mxu0 }
 0x13b   :  { %v869_v15 = vpop.eup %868  ;;  %v622_v17 = vpop.f32.mrf.mxu1  ;;  %v618_v20 = vadd.f32 %v743_v12, %v617_v16  ;;  %v683_v29 = vsub.f32 %v865_v11, %v867_v13 }
 0x13c   :  { %671 = vst [vmem:[#allocation9 + $0x8] sm:$0xff] %v668_v14  ;;  %v663_v19 = vsub.f32 %v859_v4, %v869_v15  ;;  %v623_v21 = vadd.f32 %v743_v12, %v622_v17  ;;  %v797_v24 = vpop.f32.mrf.mxu0  ;;  %v871_v25 = vpop.eup %870 }
 0x13d   :  { %v800_v23 = vpop.f32.mrf.mxu1  ;;  %v679_v27 = vmax.f32 %v618_v20, 0.0  ;;  %v873_v30 = vpop.eup %872 }
 0x13e   :  { %v666_v26 = vmul.f32 %v663_v19, %v660_v18  ;;  %v680_v28 = vmax.f32 %v623_v21, 0.0  ;;  %v684_v40 = vsub.f32 %v871_v25, %v873_v30 }
 0x13f   :  { %v627_v31 = vpop.f32.mrf.mxu1  ;;  %v685_v33 = vmul.f32 %v682_v22, %v679_v27 }
 0x140   :  { %v669_v32 = vadd.f32 %v869_v15, %v666_v26  ;;  %v686_v34 = vmul.f32 %v683_v29, %v680_v28  ;;  %v628_v35 = vadd.f32 %v743_v12, %v627_v31 }
 0x141   :  { %v803_v36 = vpop.f32.mrf.mxu1  ;;  %v688_v37 = vadd.f32 %v863_v8, %v685_v33 }
 0x142   :  { %672 = vst [vmem:[#allocation9 + $0x10] sm:$0xff] %v669_v32  ;;  %v689_v38 = vadd.f32 %v867_v13, %v686_v34  ;;  %v681_v39 = vmax.f32 %v628_v35, 0.0 }
 0x143   :  { %965 = shalt.err (!%p962_p10)
}
 0x144   :  { %717 = dma.vmem_to_hbm [thread:$0]  %s712_s15, 384, %s1171_s4, [#allocation10], %s1006_s28, %s1006_s28, %s1007_s29   ;;  %691 = vst [vmem:[#allocation11] sm:$0xff] %v688_v37  ;;  %692 = vst [vmem:[#allocation11 + $0x8] sm:$0xff] %v689_v38  ;;  %v687_v42 = vmul.f32 %v684_v40, %v681_v39 }
 0x145   :  { %s974_s21 = scalar_lea.vmem %s724_s17, 384  ;;  %p979_p12 = scmp.lt.s32.totalorder %s724_s17, %s724_s17 }
 0x146   :  { %v690_v44 = vadd.f32 %v873_v30, %v687_v42  ;;  %p975_p11 = scmp.ne.s32.totalorder %s724_s17, %s974_s21  ;;  %p980_p13 = scmp.lt.s32.totalorder %s974_s21, %s974_s21 }
 0x148   :  { %693 = vst [vmem:[#allocation11 + $0x10] sm:$0xff] %v690_v44  ;;  %p981_p0 = por %p980_p13, %p979_p12 }
 0x14a   :  { %p982_p1 = pnand %p981_p0, %p975_p11 }
 0x14c   :  { %985 = shalt.err (!%p982_p1)
}
 0x14d   :  { %729 = dma.vmem_to_hbm [thread:$0]  %s724_s17, 384, %s1172_s5, [#allocation10], %s1006_s28, %s1006_s28, %s1007_s29  }
 0x14e   :  { %998 = dma.done.wait [#allocation4], 384  }
 0x14f   :  { %999 = vsyncadd [#allocation4], 4294966912 }
 0x150   :  { %1000 = dma.done.wait [#allocation10], 768  }
 0x151   :  { %1001 = vsyncadd [#allocation10], 4294966528 }
 0x152   :  { %739 = vsyncpa [#allocation3], 1 }
 0x153   :  { %740 = vsyncpa [#allocation6], 1 }
 0x154   :  { %741 = vsyncpa [#allocation4], 1 }
 0x155   :  { %742 = vsyncpa [#allocation10], 1 }

</bundles_post_ra>
